<compile_context>
chip_gen: v7x
topology: tpu7x:2x2x1
jax: 0.10.0
libtpu: 0.0.40
codegen_flags: <defaults>
</compile_context>

<pallas_src>
from functools import partial

import numpy as np
import jax
import jax.numpy as jnp
from jax.experimental import pallas as pl
from jax.experimental.pallas import tpu as pltpu


def _round_up(x, m):
    return ((x + m - 1) // m) * m


# ----------------------------------------------------------------------------
# Fused kernel: dilated convs + BN + ReLU + GAP + fc1 + fc2 + softmax + gating
# ----------------------------------------------------------------------------
def _cif_block_kernel(x_ref, wall_ref, scale_ref, shift_ref, w1_ref, w2_ref,
                      mask_ref, o_ref, xflat_ref, *, W, off, nb):
    """Processes `nb` images per grid step in a lane-dense (channels, pixels) layout.

    x_ref:     (nb, Cin, HW)       input images, pixels on lanes
    wall_ref:  (b*9*d, Cin)        all 3x3 tap weights, row = (branch, ky, kx, out_ch)
    scale_ref: (b, d, 1)           folded BN scale
    shift_ref: (b, d, 1)           folded BN shift (includes conv bias)
    w1_ref:    (d, d)              fc1 weight (out, in)
    w2_ref:    (b*d, d)            fc2 weight (out, in)
    mask_ref:  (2*b+1, HW)         column-wrap masks, row (k + b) <-> horiz shift k
    o_ref:     (nb, d, HW)         output, pixels on lanes (lane-dense store)
    xflat_ref: (Cin, 2*off + HW)   zero-haloed flattened padded image scratch
    """
    Cin, HW = x_ref.shape[1], x_ref.shape[2]
    d = w1_ref.shape[0]
    b = scale_ref.shape[0]
    FLAT = xflat_ref.shape[1]

    # Zero ONLY the halo strips (re-done every step so it is correct under
    # megacore grid sharding); the interior is fully overwritten per image.
    xflat_ref[:, 0:off] = jnp.zeros((Cin, off), jnp.float32)
    xflat_ref[:, off + HW:FLAT] = jnp.zeros((Cin, FLAT - off - HW), jnp.float32)

    for i in range(nb):
        # Interior fill: one lane-aligned store (off is a multiple of 128).
        xflat_ref[:, off:off + HW] = x_ref[i]

        # ONE deep MXU matmul yields every (branch, tap, out-channel) response
        # at every padded flat position:
        #   Y[(j*9+t)*d + oc, q] = sum_ch w_j[oc, ch, ky, kx] * xflat[ch, q]
        y_all = jnp.dot(wall_ref[...], xflat_ref[...],
                        preferred_element_type=jnp.float32)        # (b*9*d, FLAT)

        branches = []
        for j in range(b):
            dil = j + 1
            acc = jnp.zeros((d, HW), jnp.float32)
            for t in range(9):
                dy, dx = t // 3 - 1, t % 3 - 1
                row0 = (j * 9 + t) * d
                s = off + dil * (W * dy + dx)
                contrib = y_all[row0:row0 + d, s:s + HW]           # (d, HW)
                if dx != 0:
                    k = dil * dx
                    # kill contributions that wrapped across image rows
                    contrib = contrib * mask_ref[k + b:k + b + 1, :]
                acc = acc + contrib
            yb = acc * scale_ref[j] + shift_ref[j]                 # folded BN (+bias)
            branches.append(jnp.maximum(yb, 0.0))                  # ReLU

        # ---- F = sum of branches ; S = global average pool -> (d, 1)
        f = branches[0]
        for j in range(1, b):
            f = f + branches[j]
        s_vec = jnp.mean(f, axis=1, keepdims=True)                 # (d, 1)

        # ---- gating: fc1 -> ReLU -> fused fc2 -> softmax over branches
        s8 = jnp.broadcast_to(s_vec, (d, 8))      # avoid degenerate N=1 matmul
        z8 = jnp.maximum(
            jnp.dot(w1_ref[...], s8, preferred_element_type=jnp.float32), 0.0)
        v8 = jnp.dot(w2_ref[...], z8, preferred_element_type=jnp.float32)  # (b*d, 8)
        logits = [v8[j * d:(j + 1) * d, 0:1] for j in range(b)]    # each (d, 1)
        m = logits[0]
        for j in range(1, b):
            m = jnp.maximum(m, logits[j])
        exps = [jnp.exp(l - m) for l in logits]
        den = exps[0]
        for j in range(1, b):
            den = den + exps[j]

        # ---- gated sum of branches, lane-dense store
        out = branches[0] * (exps[0] / den)
        for j in range(1, b):
            out = out + branches[j] * (exps[j] / den)
        o_ref[i] = out


def _pick_images_per_step(n):
    # Keep >= 2 grid steps (v7x: both TensorCores busy), but amortize the
    # per-step overhead for larger batches.
    best = 1
    for cand in range(2, min(8, n // 2) + 1):
        if n % cand == 0:
            best = cand
    return best


# ----------------------------------------------------------------------------
# Wrapper (pallas_call plumbing); NCHW in / NCHW out, like PyTorch
# ----------------------------------------------------------------------------
@jax.jit
def cif_block_forward(params, x_nchw):
    N, Cin, H, W = x_nchw.shape
    wall = params["wall"]
    scale = params["scale"]
    shift = params["shift"]
    w1 = params["w1"]
    w2 = params["w2"]
    b, d, _ = scale.shape
    HW = H * W

    # halo width: >= b*(W+1) for the largest dilation, multiple of 128 so the
    # interior fill is a lane-aligned store.
    off = max(128, _round_up(b * (W + 1), 128))
    flat = 2 * off + HW
    nb = _pick_images_per_step(N)

    # column-wrap masks (compile-time constants): mask[k+b, m] = (0 <= m%W + k < W)
    col = np.arange(HW) % W
    mask_np = np.stack([((col + k >= 0) & (col + k < W)).astype(np.float32)
                        for k in range(-b, b + 1)], axis=0)
    masks = jnp.asarray(mask_np)                                   # (2b+1, HW)

    x_flat = x_nchw.reshape(N, Cin, HW)          # free reshape, no transpose

    kernel = partial(_cif_block_kernel, W=W, off=off, nb=nb)
    out = pl.pallas_call(
        kernel,
        out_shape=jax.ShapeDtypeStruct((N, d, HW), jnp.float32),
        grid=(N // nb,),
        in_specs=[
            pl.BlockSpec((nb, Cin, HW), lambda n: (n, 0, 0)),
            pl.BlockSpec(wall.shape, lambda n: (0, 0)),
            pl.BlockSpec(scale.shape, lambda n: (0, 0, 0)),
            pl.BlockSpec(shift.shape, lambda n: (0, 0, 0)),
            pl.BlockSpec(w1.shape, lambda n: (0, 0)),
            pl.BlockSpec(w2.shape, lambda n: (0, 0)),
            pl.BlockSpec(masks.shape, lambda n: (0, 0)),
        ],
        out_specs=pl.BlockSpec((nb, d, HW), lambda n: (n, 0, 0)),
        scratch_shapes=[pltpu.VMEM((Cin, flat), jnp.float32)],
        compiler_params=pltpu.CompilerParams(
            dimension_semantics=("parallel",),
            vmem_limit_bytes=32 * 1024 * 1024,
        ),
    )(x_flat, wall, scale, shift, w1, w2, masks)

    # (N, d, H*W) -> (N, d, H, W): free reshape (no transpose).
    return out.reshape(N, d, H, W)


# ----------------------------------------------------------------------------
# Parameter construction (deterministic, synthetic) + host-side packing
# ----------------------------------------------------------------------------
def make_cif_block_params(key, in_channels, out_channels, r=16, b=3, eps=1e-5):
    d = in_channels // r
    assert d >= 1, "in_channels must be >= r"
    # The module's gating reshape assumes out_channels // 16 == in_channels // r
    # (true for the standard in_channels == out_channels usage).
    assert out_channels // 16 == d

    keys = jax.random.split(key, 4 * b + 2)
    conv = []
    for j in range(b):
        kw, kb, kg, kbeta = keys[4 * j:4 * j + 4]
        w = jax.random.normal(kw, (d, in_channels, 3, 3), jnp.float32) * 0.1  # OIHW
        bias = jax.random.normal(kb, (d,), jnp.float32) * 0.1
        gamma = 1.0 + 0.1 * jax.random.normal(kg, (d,), jnp.float32)
        beta = 0.1 * jax.random.normal(kbeta, (d,), jnp.float32)
        conv.append({"w": w, "b": bias, "gamma": gamma, "beta": beta})
    w1 = jax.random.normal(keys[-2], (d, d), jnp.float32) * 0.1       # fc1 (out, in)
    w2 = jax.random.normal(keys[-1], (b * d, d), jnp.float32) * 0.1   # fc2 (out, in)

    # ---- pack for the kernel: no channel padding, no in-kernel transposes ----
    wall_rows, scales, shifts = [], [], []
    for j in range(b):
        w = conv[j]["w"]                                            # (d, Cin, 3, 3)
        # rows ordered (ky, kx, out_channel); columns = input channel
        wall_rows.append(jnp.transpose(w, (2, 3, 0, 1)).reshape(9 * d, in_channels))
        # eval-mode BN fold (running_mean=0, running_var=1) + conv bias
        sc = conv[j]["gamma"] / jnp.sqrt(1.0 + eps)
        sh = conv[j]["beta"] + sc * conv[j]["b"]
        scales.append(sc.reshape(d, 1))
        shifts.append(sh.reshape(d, 1))

    return {
        # raw parameters (used by the pure-JAX reference)
        "conv": conv, "eps": eps,
        # packed parameters (used by the Pallas kernel)
        "wall": jnp.concatenate(wall_rows, axis=0),                 # (b*9*d, Cin)
        "scale": jnp.stack(scales, axis=0),                         # (b, d, 1)
        "shift": jnp.stack(shifts, axis=0),                         # (b, d, 1)
        "w1": w1,                                                   # (d, d)
        "w2": w2,                                                   # (b*d, d)
    }


# ----------------------------------------------------------------------------
# Pure-JAX reference (for correctness check)
# ----------------------------------------------------------------------------
def cif_block_ref(params, x_nchw):
    conv = params["conv"]
    b = len(conv)
    d = params["w1"].shape[0]
    eps = params["eps"]
    hi = jax.lax.Precision.HIGHEST

    outs1 = []
    for j in range(b):
        dil = j + 1
        c = conv[j]
        y = jax.lax.conv_general_dilated(
            x_nchw, c["w"], window_strides=(1, 1),
            padding=((dil, dil), (dil, dil)), rhs_dilation=(dil, dil),
            dimension_numbers=("NCHW", "OIHW", "NCHW"), precision=hi)
        y = y + c["b"][None, :, None, None]
        y = y / jnp.sqrt(1.0 + eps) * c["gamma"][None, :, None, None] \
            + c["beta"][None, :, None, None]
        outs1.append(jnp.maximum(y, 0.0))

    F = outs1[0]
    for j in range(1, b):
        F = F + outs1[j]
    S = jnp.mean(F, axis=(2, 3))                                      # (N, d)
    Z = jnp.maximum(jnp.einsum("ni,oi->no", S, params["w1"], precision=hi), 0.0)
    V = jnp.einsum("ni,oi->no", Z, params["w2"], precision=hi)        # (N, b*d)
    A = jax.nn.softmax(V.reshape(-1, b, d), axis=1)                   # (N, b, d)
    out = outs1[0] * A[:, 0, :, None, None]
    for j in range(1, b):
        out = out + outs1[j] * A[:, j, :, None, None]
    return out


if __name__ == "__main__":
    key = jax.random.PRNGKey(0)
    k_x, k_p = jax.random.split(key)

    # r=16 (module default) => d = 64 // 16 = 4 output channels.
    N, Cin, H, W = 2, 64, 16, 16
    Cout = 64
    x = jax.random.normal(k_x, (N, Cin, H, W), jnp.float32)   # NCHW, like PyTorch
    params = make_cif_block_params(k_p, Cin, Cout)

    out = jax.block_until_ready(cif_block_forward(params, x))

    ref = cif_block_ref(params, x)
    d = Cin // 16
    assert out.shape == (N, d, H, W), out.shape
    max_err = float(jnp.max(jnp.abs(out - ref)))
    assert jnp.allclose(out, ref, atol=1e-3, rtol=1e-3), max_err

    print("KERNEL_OK")
</pallas_src>

<mosaic_0001>
module attributes {stable_mosaic.version = 11 : i64} {
  func.func @_cif_block_kernel(%arg0: i32, %arg1: memref<1x64x256xf32, #tpu.memory_space<vmem>>, %arg2: memref<108x64xf32, #tpu.memory_space<vmem>>, %arg3: memref<3x4x1xf32, #tpu.memory_space<vmem>>, %arg4: memref<3x4x1xf32, #tpu.memory_space<vmem>>, %arg5: memref<4x4xf32, #tpu.memory_space<vmem>>, %arg6: memref<12x4xf32, #tpu.memory_space<vmem>>, %arg7: memref<7x256xf32, #tpu.memory_space<vmem>>, %arg8: memref<1x4x256xf32, #tpu.memory_space<vmem>>, %arg9: memref<64x512xf32, #tpu.memory_space<vmem>>) attributes {dimension_semantics = [#tpu.dimension_semantics<parallel>], iteration_bounds = array<i64: 2>, scalar_prefetch = 0 : i64, scratch_operands = 1 : i64, tpu.core_type = #tpu.core_type<tc>, window_params = [{transform_indices = @transform_0, window_bounds = array<i64: 1, 64, 256>}, {pipeline_mode = #tpu.pipeline_mode<synchronous>, transform_indices = @transform_1, window_bounds = array<i64: 108, 64>}, {pipeline_mode = #tpu.pipeline_mode<synchronous>, transform_indices = @transform_2, window_bounds = array<i64: 3, 4, 1>}, {pipeline_mode = #tpu.pipeline_mode<synchronous>, transform_indices = @transform_3, window_bounds = array<i64: 3, 4, 1>}, {pipeline_mode = #tpu.pipeline_mode<synchronous>, transform_indices = @transform_4, window_bounds = array<i64: 4, 4>}, {pipeline_mode = #tpu.pipeline_mode<synchronous>, transform_indices = @transform_5, window_bounds = array<i64: 12, 4>}, {pipeline_mode = #tpu.pipeline_mode<synchronous>, transform_indices = @transform_6, window_bounds = array<i64: 7, 256>}, {transform_indices = @transform_7, window_bounds = array<i64: 1, 4, 256>}]} {
    %cst = arith.constant 0.000000e+00 : f32
    %0 = vector.broadcast %cst : f32 to vector<64x128xf32>
    %c0 = arith.constant 0 : index
    %c0_0 = arith.constant 0 : index
    %1 = vector.load %arg9[%c0, %c0_0] : memref<64x512xf32, #tpu.memory_space<vmem>>, vector<64x128xf32>
    tpu.vector_store %arg9[%c0, %c0_0], %0 {strides = array<i32>} : memref<64x512xf32, #tpu.memory_space<vmem>>, vector<64x128xf32>,
    %cst_1 = arith.constant 0.000000e+00 : f32
    %2 = vector.broadcast %cst_1 : f32 to vector<64x128xf32>
    %c0_2 = arith.constant 0 : index
    %c384 = arith.constant 384 : index
    %3 = vector.load %arg9[%c0_2, %c384] : memref<64x512xf32, #tpu.memory_space<vmem>>, vector<64x128xf32>
    tpu.vector_store %arg9[%c0_2, %c384], %2 {strides = array<i32>} : memref<64x512xf32, #tpu.memory_space<vmem>>, vector<64x128xf32>,
    %c0_3 = arith.constant 0 : index
    %c0_4 = arith.constant 0 : index
    %c0_5 = arith.constant 0 : index
    %4 = vector.load %arg1[%c0_3, %c0_4, %c0_5] : memref<1x64x256xf32, #tpu.memory_space<vmem>>, vector<1x64x256xf32>
    %5 = vector.shape_cast %4 : vector<1x64x256xf32> to vector<64x256xf32>
    %c0_6 = arith.constant 0 : index
    %c128 = arith.constant 128 : index
    %6 = vector.load %arg9[%c0_6, %c128] : memref<64x512xf32, #tpu.memory_space<vmem>>, vector<64x256xf32>
    tpu.vector_store %arg9[%c0_6, %c128], %5 {strides = array<i32>} : memref<64x512xf32, #tpu.memory_space<vmem>>, vector<64x256xf32>,
    %c0_7 = arith.constant 0 : index
    %c0_8 = arith.constant 0 : index
    %7 = vector.load %arg2[%c0_7, %c0_8] : memref<108x64xf32, #tpu.memory_space<vmem>>, vector<108x64xf32>
    %c0_9 = arith.constant 0 : index
    %c0_10 = arith.constant 0 : index
    %8 = vector.load %arg9[%c0_9, %c0_10] : memref<64x512xf32, #tpu.memory_space<vmem>>, vector<64x512xf32>
    %cst_11 = arith.constant dense<0.000000e+00> : vector<108x512xf32>
    %9 = tpu.matmul %7, %8, %cst_11 {dimension_numbers = #tpu.dot_dimension_numbers<[1], [0], [0], [1], [0, 0, 1, 1], [], []>} : vector<108x64xf32>, vector<64x512xf32>, vector<108x512xf32> -> vector<108x512xf32>
    %cst_12 = arith.constant 0.000000e+00 : f32
    %10 = vector.broadcast %cst_12 : f32 to vector<4x256xf32>
    %11 = vector.extract_strided_slice %9 {offsets = [0, 111], sizes = [4, 256], strides = [1, 1]} : vector<108x512xf32> to vector<4x256xf32>
    %c2 = arith.constant 2 : index
    %c0_13 = arith.constant 0 : index
    %12 = vector.load %arg7[%c2, %c0_13] : memref<7x256xf32, #tpu.memory_space<vmem>>, vector<1x256xf32>
    %13 = vector.broadcast %12 : vector<1x256xf32> to vector<4x256xf32>
    %14 = arith.mulf %11, %13 : vector<4x256xf32>
    %15 = arith.addf %10, %14 : vector<4x256xf32>
    %16 = vector.extract_strided_slice %9 {offsets = [4, 112], sizes = [4, 256], strides = [1, 1]} : vector<108x512xf32> to vector<4x256xf32>
    %17 = arith.addf %15, %16 : vector<4x256xf32>
    %18 = vector.extract_strided_slice %9 {offsets = [8, 113], sizes = [4, 256], strides = [1, 1]} : vector<108x512xf32> to vector<4x256xf32>
    %c4 = arith.constant 4 : index
    %c0_14 = arith.constant 0 : index
    %19 = vector.load %arg7[%c4, %c0_14] : memref<7x256xf32, #tpu.memory_space<vmem>>, vector<1x256xf32>
    %20 = vector.broadcast %19 : vector<1x256xf32> to vector<4x256xf32>
    %21 = arith.mulf %18, %20 : vector<4x256xf32>
    %22 = arith.addf %17, %21 : vector<4x256xf32>
    %23 = vector.extract_strided_slice %9 {offsets = [12, 127], sizes = [4, 256], strides = [1, 1]} : vector<108x512xf32> to vector<4x256xf32>
    %c2_15 = arith.constant 2 : index
    %c0_16 = arith.constant 0 : index
    %24 = vector.load %arg7[%c2_15, %c0_16] : memref<7x256xf32, #tpu.memory_space<vmem>>, vector<1x256xf32>
    %25 = vector.broadcast %24 : vector<1x256xf32> to vector<4x256xf32>
    %26 = arith.mulf %23, %25 : vector<4x256xf32>
    %27 = arith.addf %22, %26 : vector<4x256xf32>
    %28 = vector.extract_strided_slice %9 {offsets = [16, 128], sizes = [4, 256], strides = [1, 1]} : vector<108x512xf32> to vector<4x256xf32>
    %29 = arith.addf %27, %28 : vector<4x256xf32>
    %30 = vector.extract_strided_slice %9 {offsets = [20, 129], sizes = [4, 256], strides = [1, 1]} : vector<108x512xf32> to vector<4x256xf32>
    %c4_17 = arith.constant 4 : index
    %c0_18 = arith.constant 0 : index
    %31 = vector.load %arg7[%c4_17, %c0_18] : memref<7x256xf32, #tpu.memory_space<vmem>>, vector<1x256xf32>
    %32 = vector.broadcast %31 : vector<1x256xf32> to vector<4x256xf32>
    %33 = arith.mulf %30, %32 : vector<4x256xf32>
    %34 = arith.addf %29, %33 : vector<4x256xf32>
    %35 = vector.extract_strided_slice %9 {offsets = [24, 143], sizes = [4, 256], strides = [1, 1]} : vector<108x512xf32> to vector<4x256xf32>
    %c2_19 = arith.constant 2 : index
    %c0_20 = arith.constant 0 : index
    %36 = vector.load %arg7[%c2_19, %c0_20] : memref<7x256xf32, #tpu.memory_space<vmem>>, vector<1x256xf32>
    %37 = vector.broadcast %36 : vector<1x256xf32> to vector<4x256xf32>
    %38 = arith.mulf %35, %37 : vector<4x256xf32>
    %39 = arith.addf %34, %38 : vector<4x256xf32>
    %40 = vector.extract_strided_slice %9 {offsets = [28, 144], sizes = [4, 256], strides = [1, 1]} : vector<108x512xf32> to vector<4x256xf32>
    %41 = arith.addf %39, %40 : vector<4x256xf32>
    %42 = vector.extract_strided_slice %9 {offsets = [32, 145], sizes = [4, 256], strides = [1, 1]} : vector<108x512xf32> to vector<4x256xf32>
    %c4_21 = arith.constant 4 : index
    %c0_22 = arith.constant 0 : index
    %43 = vector.load %arg7[%c4_21, %c0_22] : memref<7x256xf32, #tpu.memory_space<vmem>>, vector<1x256xf32>
    %44 = vector.broadcast %43 : vector<1x256xf32> to vector<4x256xf32>
    %45 = arith.mulf %42, %44 : vector<4x256xf32>
    %46 = arith.addf %41, %45 : vector<4x256xf32>
    %c0_23 = arith.constant 0 : index
    %c0_24 = arith.constant 0 : index
    %c0_25 = arith.constant 0 : index
    %47 = vector.load %arg3[%c0_23, %c0_24, %c0_25] : memref<3x4x1xf32, #tpu.memory_space<vmem>>, vector<1x4x1xf32>
    %48 = vector.shape_cast %47 : vector<1x4x1xf32> to vector<4x1xf32>
    %49 = vector.broadcast %48 : vector<4x1xf32> to vector<4x256xf32>
    %50 = arith.mulf %46, %49 : vector<4x256xf32>
    %c0_26 = arith.constant 0 : index
    %c0_27 = arith.constant 0 : index
    %c0_28 = arith.constant 0 : index
    %51 = vector.load %arg4[%c0_26, %c0_27, %c0_28] : memref<3x4x1xf32, #tpu.memory_space<vmem>>, vector<1x4x1xf32>
    %52 = vector.shape_cast %51 : vector<1x4x1xf32> to vector<4x1xf32>
    %53 = vector.broadcast %52 : vector<4x1xf32> to vector<4x256xf32>
    %54 = arith.addf %50, %53 : vector<4x256xf32>
    %cst_29 = arith.constant 0.000000e+00 : f32
    %55 = vector.broadcast %cst_29 : f32 to vector<4x256xf32>
    %56 = arith.maximumf %54, %55 : vector<4x256xf32>
    %cst_30 = arith.constant 0.000000e+00 : f32
    %57 = vector.broadcast %cst_30 : f32 to vector<4x256xf32>
    %58 = vector.extract_strided_slice %9 {offsets = [36, 94], sizes = [4, 256], strides = [1, 1]} : vector<108x512xf32> to vector<4x256xf32>
    %c1 = arith.constant 1 : index
    %c0_31 = arith.constant 0 : index
    %59 = vector.load %arg7[%c1, %c0_31] : memref<7x256xf32, #tpu.memory_space<vmem>>, vector<1x256xf32>
    %60 = vector.broadcast %59 : vector<1x256xf32> to vector<4x256xf32>
    %61 = arith.mulf %58, %60 : vector<4x256xf32>
    %62 = arith.addf %57, %61 : vector<4x256xf32>
    %63 = vector.extract_strided_slice %9 {offsets = [40, 96], sizes = [4, 256], strides = [1, 1]} : vector<108x512xf32> to vector<4x256xf32>
    %64 = arith.addf %62, %63 : vector<4x256xf32>
    %65 = vector.extract_strided_slice %9 {offsets = [44, 98], sizes = [4, 256], strides = [1, 1]} : vector<108x512xf32> to vector<4x256xf32>
    %c5 = arith.constant 5 : index
    %c0_32 = arith.constant 0 : index
    %66 = vector.load %arg7[%c5, %c0_32] : memref<7x256xf32, #tpu.memory_space<vmem>>, vector<1x256xf32>
    %67 = vector.broadcast %66 : vector<1x256xf32> to vector<4x256xf32>
    %68 = arith.mulf %65, %67 : vector<4x256xf32>
    %69 = arith.addf %64, %68 : vector<4x256xf32>
    %70 = vector.extract_strided_slice %9 {offsets = [48, 126], sizes = [4, 256], strides = [1, 1]} : vector<108x512xf32> to vector<4x256xf32>
    %c1_33 = arith.constant 1 : index
    %c0_34 = arith.constant 0 : index
    %71 = vector.load %arg7[%c1_33, %c0_34] : memref<7x256xf32, #tpu.memory_space<vmem>>, vector<1x256xf32>
    %72 = vector.broadcast %71 : vector<1x256xf32> to vector<4x256xf32>
    %73 = arith.mulf %70, %72 : vector<4x256xf32>
    %74 = arith.addf %69, %73 : vector<4x256xf32>
    %75 = vector.extract_strided_slice %9 {offsets = [52, 128], sizes = [4, 256], strides = [1, 1]} : vector<108x512xf32> to vector<4x256xf32>
    %76 = arith.addf %74, %75 : vector<4x256xf32>
    %77 = vector.extract_strided_slice %9 {offsets = [56, 130], sizes = [4, 256], strides = [1, 1]} : vector<108x512xf32> to vector<4x256xf32>
    %c5_35 = arith.constant 5 : index
    %c0_36 = arith.constant 0 : index
    %78 = vector.load %arg7[%c5_35, %c0_36] : memref<7x256xf32, #tpu.memory_space<vmem>>, vector<1x256xf32>
    %79 = vector.broadcast %78 : vector<1x256xf32> to vector<4x256xf32>
    %80 = arith.mulf %77, %79 : vector<4x256xf32>
    %81 = arith.addf %76, %80 : vector<4x256xf32>
    %82 = vector.extract_strided_slice %9 {offsets = [60, 158], sizes = [4, 256], strides = [1, 1]} : vector<108x512xf32> to vector<4x256xf32>
    %c1_37 = arith.constant 1 : index
    %c0_38 = arith.constant 0 : index
    %83 = vector.load %arg7[%c1_37, %c0_38] : memref<7x256xf32, #tpu.memory_space<vmem>>, vector<1x256xf32>
    %84 = vector.broadcast %83 : vector<1x256xf32> to vector<4x256xf32>
    %85 = arith.mulf %82, %84 : vector<4x256xf32>
    %86 = arith.addf %81, %85 : vector<4x256xf32>
    %87 = vector.extract_strided_slice %9 {offsets = [64, 160], sizes = [4, 256], strides = [1, 1]} : vector<108x512xf32> to vector<4x256xf32>
    %88 = arith.addf %86, %87 : vector<4x256xf32>
    %89 = vector.extract_strided_slice %9 {offsets = [68, 162], sizes = [4, 256], strides = [1, 1]} : vector<108x512xf32> to vector<4x256xf32>
    %c5_39 = arith.constant 5 : index
    %c0_40 = arith.constant 0 : index
    %90 = vector.load %arg7[%c5_39, %c0_40] : memref<7x256xf32, #tpu.memory_space<vmem>>, vector<1x256xf32>
    %91 = vector.broadcast %90 : vector<1x256xf32> to vector<4x256xf32>
    %92 = arith.mulf %89, %91 : vector<4x256xf32>
    %93 = arith.addf %88, %92 : vector<4x256xf32>
    %c1_41 = arith.constant 1 : index
    %c0_42 = arith.constant 0 : index
    %c0_43 = arith.constant 0 : index
    %94 = vector.load %arg3[%c1_41, %c0_42, %c0_43] : memref<3x4x1xf32, #tpu.memory_space<vmem>>, vector<1x4x1xf32>
    %95 = vector.shape_cast %94 : vector<1x4x1xf32> to vector<4x1xf32>
    %96 = vector.broadcast %95 : vector<4x1xf32> to vector<4x256xf32>
    %97 = arith.mulf %93, %96 : vector<4x256xf32>
    %c1_44 = arith.constant 1 : index
    %c0_45 = arith.constant 0 : index
    %c0_46 = arith.constant 0 : index
    %98 = vector.load %arg4[%c1_44, %c0_45, %c0_46] : memref<3x4x1xf32, #tpu.memory_space<vmem>>, vector<1x4x1xf32>
    %99 = vector.shape_cast %98 : vector<1x4x1xf32> to vector<4x1xf32>
    %100 = vector.broadcast %99 : vector<4x1xf32> to vector<4x256xf32>
    %101 = arith.addf %97, %100 : vector<4x256xf32>
    %cst_47 = arith.constant 0.000000e+00 : f32
    %102 = vector.broadcast %cst_47 : f32 to vector<4x256xf32>
    %103 = arith.maximumf %101, %102 : vector<4x256xf32>
    %cst_48 = arith.constant 0.000000e+00 : f32
    %104 = vector.broadcast %cst_48 : f32 to vector<4x256xf32>
    %105 = vector.extract_strided_slice %9 {offsets = [72, 77], sizes = [4, 256], strides = [1, 1]} : vector<108x512xf32> to vector<4x256xf32>
    %c0_49 = arith.constant 0 : index
    %c0_50 = arith.constant 0 : index
    %106 = vector.load %arg7[%c0_49, %c0_50] : memref<7x256xf32, #tpu.memory_space<vmem>>, vector<1x256xf32>
    %107 = vector.broadcast %106 : vector<1x256xf32> to vector<4x256xf32>
    %108 = arith.mulf %105, %107 : vector<4x256xf32>
    %109 = arith.addf %104, %108 : vector<4x256xf32>
    %110 = vector.extract_strided_slice %9 {offsets = [76, 80], sizes = [4, 256], strides = [1, 1]} : vector<108x512xf32> to vector<4x256xf32>
    %111 = arith.addf %109, %110 : vector<4x256xf32>
    %112 = vector.extract_strided_slice %9 {offsets = [80, 83], sizes = [4, 256], strides = [1, 1]} : vector<108x512xf32> to vector<4x256xf32>
    %c6 = arith.constant 6 : index
    %c0_51 = arith.constant 0 : index
    %113 = vector.load %arg7[%c6, %c0_51] : memref<7x256xf32, #tpu.memory_space<vmem>>, vector<1x256xf32>
    %114 = vector.broadcast %113 : vector<1x256xf32> to vector<4x256xf32>
    %115 = arith.mulf %112, %114 : vector<4x256xf32>
    %116 = arith.addf %111, %115 : vector<4x256xf32>
    %117 = vector.extract_strided_slice %9 {offsets = [84, 125], sizes = [4, 256], strides = [1, 1]} : vector<108x512xf32> to vector<4x256xf32>
    %c0_52 = arith.constant 0 : index
    %c0_53 = arith.constant 0 : index
    %118 = vector.load %arg7[%c0_52, %c0_53] : memref<7x256xf32, #tpu.memory_space<vmem>>, vector<1x256xf32>
    %119 = vector.broadcast %118 : vector<1x256xf32> to vector<4x256xf32>
    %120 = arith.mulf %117, %119 : vector<4x256xf32>
    %121 = arith.addf %116, %120 : vector<4x256xf32>
    %122 = vector.extract_strided_slice %9 {offsets = [88, 128], sizes = [4, 256], strides = [1, 1]} : vector<108x512xf32> to vector<4x256xf32>
    %123 = arith.addf %121, %122 : vector<4x256xf32>
    %124 = vector.extract_strided_slice %9 {offsets = [92, 131], sizes = [4, 256], strides = [1, 1]} : vector<108x512xf32> to vector<4x256xf32>
    %c6_54 = arith.constant 6 : index
    %c0_55 = arith.constant 0 : index
    %125 = vector.load %arg7[%c6_54, %c0_55] : memref<7x256xf32, #tpu.memory_space<vmem>>, vector<1x256xf32>
    %126 = vector.broadcast %125 : vector<1x256xf32> to vector<4x256xf32>
    %127 = arith.mulf %124, %126 : vector<4x256xf32>
    %128 = arith.addf %123, %127 : vector<4x256xf32>
    %129 = vector.extract_strided_slice %9 {offsets = [96, 173], sizes = [4, 256], strides = [1, 1]} : vector<108x512xf32> to vector<4x256xf32>
    %c0_56 = arith.constant 0 : index
    %c0_57 = arith.constant 0 : index
    %130 = vector.load %arg7[%c0_56, %c0_57] : memref<7x256xf32, #tpu.memory_space<vmem>>, vector<1x256xf32>
    %131 = vector.broadcast %130 : vector<1x256xf32> to vector<4x256xf32>
    %132 = arith.mulf %129, %131 : vector<4x256xf32>
    %133 = arith.addf %128, %132 : vector<4x256xf32>
    %134 = vector.extract_strided_slice %9 {offsets = [100, 176], sizes = [4, 256], strides = [1, 1]} : vector<108x512xf32> to vector<4x256xf32>
    %135 = arith.addf %133, %134 : vector<4x256xf32>
    %136 = vector.extract_strided_slice %9 {offsets = [104, 179], sizes = [4, 256], strides = [1, 1]} : vector<108x512xf32> to vector<4x256xf32>
    %c6_58 = arith.constant 6 : index
    %c0_59 = arith.constant 0 : index
    %137 = vector.load %arg7[%c6_58, %c0_59] : memref<7x256xf32, #tpu.memory_space<vmem>>, vector<1x256xf32>
    %138 = vector.broadcast %137 : vector<1x256xf32> to vector<4x256xf32>
    %139 = arith.mulf %136, %138 : vector<4x256xf32>
    %140 = arith.addf %135, %139 : vector<4x256xf32>
    %c2_60 = arith.constant 2 : index
    %c0_61 = arith.constant 0 : index
    %c0_62 = arith.constant 0 : index
    %141 = vector.load %arg3[%c2_60, %c0_61, %c0_62] : memref<3x4x1xf32, #tpu.memory_space<vmem>>, vector<1x4x1xf32>
    %142 = vector.shape_cast %141 : vector<1x4x1xf32> to vector<4x1xf32>
    %143 = vector.broadcast %142 : vector<4x1xf32> to vector<4x256xf32>
    %144 = arith.mulf %140, %143 : vector<4x256xf32>
    %c2_63 = arith.constant 2 : index
    %c0_64 = arith.constant 0 : index
    %c0_65 = arith.constant 0 : index
    %145 = vector.load %arg4[%c2_63, %c0_64, %c0_65] : memref<3x4x1xf32, #tpu.memory_space<vmem>>, vector<1x4x1xf32>
    %146 = vector.shape_cast %145 : vector<1x4x1xf32> to vector<4x1xf32>
    %147 = vector.broadcast %146 : vector<4x1xf32> to vector<4x256xf32>
    %148 = arith.addf %144, %147 : vector<4x256xf32>
    %cst_66 = arith.constant 0.000000e+00 : f32
    %149 = vector.broadcast %cst_66 : f32 to vector<4x256xf32>
    %150 = arith.maximumf %148, %149 : vector<4x256xf32>
    %151 = arith.addf %56, %103 : vector<4x256xf32>
    %152 = arith.addf %151, %150 : vector<4x256xf32>
    %cst_67 = arith.constant dense<0.000000e+00> : vector<4xf32>
    %153 = vector.multi_reduction <add>, %152, %cst_67 [1] : vector<4x256xf32> to vector<4xf32>
    %154 = vector.shape_cast %153 : vector<4xf32> to vector<4x1xf32>
    %cst_68 = arith.constant 2.560000e+02 : f32
    %155 = vector.broadcast %cst_68 : f32 to vector<4x1xf32>
    %156 = arith.divf %154, %155 : vector<4x1xf32>
    %157 = vector.shape_cast %156 : vector<4x1xf32> to vector<4x1xf32>
    %158 = vector.broadcast %157 : vector<4x1xf32> to vector<4x8xf32>
    %c0_69 = arith.constant 0 : index
    %c0_70 = arith.constant 0 : index
    %159 = vector.load %arg5[%c0_69, %c0_70] : memref<4x4xf32, #tpu.memory_space<vmem>>, vector<4x4xf32>
    %cst_71 = arith.constant dense<0.000000e+00> : vector<4x8xf32>
    %160 = tpu.matmul %159, %158, %cst_71 {dimension_numbers = #tpu.dot_dimension_numbers<[1], [0], [0], [1], [0, 0, 1, 1], [], []>} : vector<4x4xf32>, vector<4x8xf32>, vector<4x8xf32> -> vector<4x8xf32>
    %cst_72 = arith.constant 0.000000e+00 : f32
    %161 = vector.broadcast %cst_72 : f32 to vector<4x8xf32>
    %162 = arith.maximumf %160, %161 : vector<4x8xf32>
    %c0_73 = arith.constant 0 : index
    %c0_74 = arith.constant 0 : index
    %163 = vector.load %arg6[%c0_73, %c0_74] : memref<12x4xf32, #tpu.memory_space<vmem>>, vector<12x4xf32>
    %cst_75 = arith.constant dense<0.000000e+00> : vector<12x8xf32>
    %164 = tpu.matmul %163, %162, %cst_75 {dimension_numbers = #tpu.dot_dimension_numbers<[1], [0], [0], [1], [0, 0, 1, 1], [], []>} : vector<12x4xf32>, vector<4x8xf32>, vector<12x8xf32> -> vector<12x8xf32>
    %165 = vector.extract_strided_slice %164 {offsets = [0, 0], sizes = [4, 1], strides = [1, 1]} : vector<12x8xf32> to vector<4x1xf32>
    %166 = vector.extract_strided_slice %164 {offsets = [4, 0], sizes = [4, 1], strides = [1, 1]} : vector<12x8xf32> to vector<4x1xf32>
    %167 = vector.extract_strided_slice %164 {offsets = [8, 0], sizes = [4, 1], strides = [1, 1]} : vector<12x8xf32> to vector<4x1xf32>
    %168 = arith.maximumf %165, %166 : vector<4x1xf32>
    %169 = arith.maximumf %168, %167 : vector<4x1xf32>
    %170 = arith.subf %165, %169 : vector<4x1xf32>
    %171 = math.exp %170 : vector<4x1xf32>
    %172 = arith.subf %166, %169 : vector<4x1xf32>
    %173 = math.exp %172 : vector<4x1xf32>
    %174 = arith.subf %167, %169 : vector<4x1xf32>
    %175 = math.exp %174 : vector<4x1xf32>
    %176 = arith.addf %171, %173 : vector<4x1xf32>
    %177 = arith.addf %176, %175 : vector<4x1xf32>
    %178 = arith.divf %171, %177 : vector<4x1xf32>
    %179 = vector.broadcast %178 : vector<4x1xf32> to vector<4x256xf32>
    %180 = arith.mulf %56, %179 : vector<4x256xf32>
    %181 = arith.divf %173, %177 : vector<4x1xf32>
    %182 = vector.broadcast %181 : vector<4x1xf32> to vector<4x256xf32>
    %183 = arith.mulf %103, %182 : vector<4x256xf32>
    %184 = arith.addf %180, %183 : vector<4x256xf32>
    %185 = arith.divf %175, %177 : vector<4x1xf32>
    %186 = vector.broadcast %185 : vector<4x1xf32> to vector<4x256xf32>
    %187 = arith.mulf %150, %186 : vector<4x256xf32>
    %188 = arith.addf %184, %187 : vector<4x256xf32>
    %c0_76 = arith.constant 0 : index
    %c0_77 = arith.constant 0 : index
    %c0_78 = arith.constant 0 : index
    %189 = vector.load %arg8[%c0_76, %c0_77, %c0_78] : memref<1x4x256xf32, #tpu.memory_space<vmem>>, vector<1x4x256xf32>
    %190 = vector.shape_cast %189 : vector<1x4x256xf32> to vector<4x256xf32>
    %191 = vector.shape_cast %188 : vector<4x256xf32> to vector<1x4x256xf32>
    tpu.vector_store %arg8[%c0_76, %c0_77, %c0_78], %191 {strides = array<i32>} : memref<1x4x256xf32, #tpu.memory_space<vmem>>, vector<1x4x256xf32>,
    return
  }
  func.func @transform_0(%arg0: i32) -> (i32, i32, i32) {
    %c0_i32 = arith.constant 0 : i32
    %c0_i32_0 = arith.constant 0 : i32
    %c0_i32_1 = arith.constant 0 : i32
    return %arg0, %c0_i32, %c0_i32_0 : i32, i32, i32
  }
  func.func @transform_1(%arg0: i32) -> (i32, i32) {
    %c0_i32 = arith.constant 0 : i32
    %c0_i32_0 = arith.constant 0 : i32
    %c0_i32_1 = arith.constant 0 : i32
    return %c0_i32, %c0_i32_0 : i32, i32
  }
  func.func @transform_2(%arg0: i32) -> (i32, i32, i32) {
    %c0_i32 = arith.constant 0 : i32
    %c0_i32_0 = arith.constant 0 : i32
    %c0_i32_1 = arith.constant 0 : i32
    %c0_i32_2 = arith.constant 0 : i32
    return %c0_i32, %c0_i32_0, %c0_i32_1 : i32, i32, i32
  }
  func.func @transform_3(%arg0: i32) -> (i32, i32, i32) {
    %c0_i32 = arith.constant 0 : i32
    %c0_i32_0 = arith.constant 0 : i32
    %c0_i32_1 = arith.constant 0 : i32
    %c0_i32_2 = arith.constant 0 : i32
    return %c0_i32, %c0_i32_0, %c0_i32_1 : i32, i32, i32
  }
  func.func @transform_4(%arg0: i32) -> (i32, i32) {
    %c0_i32 = arith.constant 0 : i32
    %c0_i32_0 = arith.constant 0 : i32
    %c0_i32_1 = arith.constant 0 : i32
    return %c0_i32, %c0_i32_0 : i32, i32
  }
  func.func @transform_5(%arg0: i32) -> (i32, i32) {
    %c0_i32 = arith.constant 0 : i32
    %c0_i32_0 = arith.constant 0 : i32
    %c0_i32_1 = arith.constant 0 : i32
    return %c0_i32, %c0_i32_0 : i32, i32
  }
  func.func @transform_6(%arg0: i32) -> (i32, i32) {
    %c0_i32 = arith.constant 0 : i32
    %c0_i32_0 = arith.constant 0 : i32
    %c0_i32_1 = arith.constant 0 : i32
    return %c0_i32, %c0_i32_0 : i32, i32
  }
  func.func @transform_7(%arg0: i32) -> (i32, i32, i32) {
    %c0_i32 = arith.constant 0 : i32
    %c0_i32_0 = arith.constant 0 : i32
    %c0_i32_1 = arith.constant 0 : i32
    return %arg0, %c0_i32, %c0_i32_0 : i32, i32, i32
  }
}

</mosaic_0001>

<bundles_post_ra>
// kernel: cif_block_forward.1
= control target key start
LH: loop header
LB: loop body
LE: loop exit
PB: predicated region body
PF: predicated region fallthrough
CT: control target
= control target key end

     0   :  { %s2188_s24 = smov 0   ;;  %s2888_s0 = inlined_call_operand.vmem [shape: f32[2,64,256], index: 0, kind: input, shape index: {}]   ;;  %s2889_s1 = inlined_call_operand.vmem [shape: f32[108,64], index: 1, kind: input, shape index: {}]   ;;  %s2890_s2 = inlined_call_operand.vmem [shape: f32[3,4,1], index: 2, kind: input, shape index: {}]   ;;  %s2891_s3 = inlined_call_operand.vmem [shape: f32[3,4,1], index: 3, kind: input, shape index: {}]   ;;  %s2892_s4 = inlined_call_operand.vmem [shape: f32[4,4], index: 4, kind: input, shape index: {}]   ;;  %s2893_s5 = inlined_call_operand.vmem [shape: f32[12,4], index: 5, kind: input, shape index: {}]   ;;  %s2894_s6 = inlined_call_operand.vmem [shape: f32[7,256], index: 6, kind: input, shape index: {}]   ;;  %s2895_s7 = inlined_call_operand.vmem [shape: f32[2,4,256], index: 7, kind: output, shape index: {}]  }
   0x1 LB: > { %s1889_s25 = sadd.s32 4294967295, %s2109_s24   ;;  %p1893_p0 = scmp.ge.s32.totalorder %s2109_s24, 1  ;;  %s2109_s24 = sphi %s2188_s24, %s17_s24  }
   0x2   : > { %p237_p1 = scmp.lt.s32.totalorder %s2109_s24, 3 }
   0x4   : > { %p238_p2 = pnand %p1893_p0, %p237_p1 }
   0x5   : > { %p269_p3 = scmp.lt.s32.totalorder (!%p238_p2), %s1889_s25, 1  ;;  %v2199_v0 = vld [vmem:[%s2889_s1] sm:$0xff] (!%p238_p2)  ;;  %vm373_vm0 = vcmask (!%p238_p2), 523264   ;;  %v704_v1 = vlaneseq (!%p238_p2)  ;;  %v2111_v2 = vmov (!%p238_p2), 0.0   ;;  %v2112_v4 = vmov (!%p238_p2), 0   ;;  %s2113_s11 = smov (!%p238_p2), 98  }
   0x6   : > { %241 = sbr.rel (%p238_p2) target bundleno = 1718 (0x6b6), region = 48  ;;  %480 = vmatprep.mubr.f32.mxu0 (!%p238_p2), %v2111_v2  ;;  %1987 = vmatprep.mubr.msk.f32.mxu1 (!%p238_p2), %vm373_vm0, %v2199_v0  ;;  %v1929_v6 = vld [vmem:[%s2894_s6 + $0x5] ss:$8 sm:$0x3] (!%p238_p2)  ;;  %v2114_v26 = vmov (!%p238_p2), 0.0|0.0   ;;  %s2115_s16 = smov (!%p238_p2), 2  }
   0x7   : > { %v705_v3 = vshrl.u32 (!%p238_p2), %v704_v1, 7  ;;  %2091 = vset.pattern.permute.xlu0 (!%p238_p2), %v2112_v4  ;;  %2092 = vset.pattern.permute.xlu1 (!%p238_p2), %v2112_v4  ;;  %v1928_v31 = vld [vmem:[%s2894_s6 + $0x1] ss:$8 sm:$0x3] (!%p238_p2)  ;;  %s2116_s19 = smov (!%p238_p2), 126   ;;  %s2117_s20 = smov (!%p238_p2), 83  }
   0x8   : > { %v1932_v34 = vld [vmem:[%s2894_s6 + $0x6] ss:$8 sm:$0x3] (!%p238_p2)  ;;  %v1237_v39 = vld [vmem:[%s2894_s6] ss:$8 sm:$0x3] (!%p238_p2) }
   0x9   : > { %v2207_v5 = vsub.s32 (!%p238_p2), 0, %v705_v3  ;;  %v2217_v7 = vsub.s32 (!%p238_p2), 1, %v705_v3  ;;  %v328_v42 = vld [vmem:[%s2889_s1 + $0x8] sm:$0xff] (!%p238_p2)  ;;  %v329_v43 = vld [vmem:[%s2889_s1 + $0x10] sm:$0xff] (!%p238_p2)  ;;  %s2118_s27 = smov (!%p238_p2), 125   ;;  %v330_v45 = vld [vmem:[%s2889_s1 + $0x18] sm:$0xff] (!%p238_p2) }
   0xa   : > { %v331_v46 = vld [vmem:[%s2889_s1 + $0x20] sm:$0xff] (!%p238_p2)  ;;  %s2119_s9 = smov (!%p238_p2), 30   ;;  %v332_v48 = vld [vmem:[%s2889_s1 + $0x28] sm:$0xff] (!%p238_p2)  ;;  %v333_v49 = vld [vmem:[%s2889_s1 + $0x30] sm:$0xff] (!%p238_p2)  ;;  %s2120_s14 = smov (!%p238_p2), 3   ;;  %v2410_v1 = vrot.slane (!%p238_p2), %v2111_v2, 4 }
   0xb   : > { %v2223_v11 = vrot.slane (!%p238_p2), %v1929_v6, %v2207_v5  ;;  %v2233_v21 = vrot.slane (!%p238_p2), %v1929_v6, %v2217_v7  ;;  %v2250_v35 = vrot.slane (!%p238_p2), %v1928_v31, %v2207_v5  ;;  %v2254_v38 = vrot.slane (!%p238_p2), %v1932_v34, %v2207_v5  ;;  %v334_v50 = vld [vmem:[%s2889_s1 + $0x38] sm:$0xff] (!%p238_p2)  ;;  %v335_v51 = vld [vmem:[%s2889_s1 + $0x40] sm:$0xff] (!%p238_p2)  ;;  %v336_v52 = vld [vmem:[%s2889_s1 + $0x48] sm:$0xff] (!%p238_p2)  ;;  %s2124_s15 = smov (!%p238_p2), 94   ;;  %s2125_s18 = smov (!%p238_p2), 113  }
   0xc   : > { %v2262_v40 = vrot.slane (!%p238_p2), %v1928_v31, %v2217_v7  ;;  %v2266_v41 = vrot.slane (!%p238_p2), %v1237_v39, %v2207_v5  ;;  %v2283_v44 = vrot.slane (!%p238_p2), %v1932_v34, %v2217_v7  ;;  %v2298_v47 = vrot.slane (!%p238_p2), %v1237_v39, %v2217_v7  ;;  %v337_v53 = vld [vmem:[%s2889_s1 + $0x50] sm:$0xff] (!%p238_p2)  ;;  %v338_v54 = vld [vmem:[%s2889_s1 + $0x58] sm:$0xff] (!%p238_p2)  ;;  %v339_v55 = vld [vmem:[%s2889_s1 + $0x60] sm:$0xff] (!%p238_p2)  ;;  %s2126_s21 = smov (!%p238_p2), 127   ;;  %s2127_s22 = smov (!%p238_p2), 77  }
   0xd   : > { %s2897_s25 = smov (!%p269_p3, %s1889_s25), 1  ;;  %1025 = vrot.lane.b32.xlu0 %v2223_v11, %s2113_s11  ;;  %1055 = vrot.lane.b32.xlu1 %v2250_v35, %s2116_s19  ;;  %v1927_v56 = vld [vmem:[%s2894_s6 + $0x4] ss:$8 sm:$0x3]  ;;  %v340_v57 = vld [vmem:[%s2889_s1 + $0x68] sm:$0xf] }
   0xe   : > { %s1942_s28 = sshll.u32 %s2897_s25, 7  ;;  %v758_v58 = vrot.slane %v1927_v56, %v2217_v7  ;;  %v1926_v59 = vld [vmem:[%s2894_s6 + $0x2] ss:$8 sm:$0x3]  ;;  %v754_v61 = vrot.slane %v1927_v56, %v2207_v5  ;;  %s2128_s23 = smov 1   ;;  %vm1103_vm1 = vcmask 15360  }
   0xf   : > { %s2215_s10 = scalar_lea.vmem %s2888_s0, %s1942_s28  ;;  %s2122_s28 = smov 45   ;;  %v2371_v60 = vrot.slane %v1926_v59, %v2217_v7  ;;  %v2387_v62 = vrot.slane %v1926_v59, %v2207_v5  ;;  %v1930_v63 = vld [vmem:[%s2890_s2 + $0x4] sm:$0xf]  ;;  %v1933_v3 = vld [vmem:[%s2890_s2 + $0x8] sm:$0xf]  ;;  %vm1136_vm2 = vcmask 244736  }
  0x10   : > { %v295_v8 = vld [vmem:[%s2215_s10] sm:$0xff]  ;;  %v297_v9 = vld [vmem:[%s2215_s10 + $0x10] sm:$0xff]  ;;  %v296_v10 = vld [vmem:[%s2215_s10 + $0x8] sm:$0xff]  ;;  %s2129_s29 = smov 15   ;;  %s2135_s17 = smov 92   ;;  %vm1373_vm3 = vcmask 23552  }
  0x11   : > { %v2018_v12 = vpack.c.bf16 %v297_v9, %v295_v8  ;;  %v298_v13 = vld [vmem:[%s2215_s10 + $0x18] sm:$0xff]  ;;  %v299_v14 = vld [vmem:[%s2215_s10 + $0x20] sm:$0xff]  ;;  %v301_v15 = vld [vmem:[%s2215_s10 + $0x30] sm:$0xff]  ;;  %1027 = vrot.lane.b32.xlu0 %v2233_v21, %s2113_s11  ;;  %s2132_s11 = smov 29   ;;  %s2138_s26 = smov 124   ;;  %vm1186_vm4 = vcmask 277504  }
  0x12   : > { %v2030_v16 = vpack.c.bf16 %v298_v13, %v296_v10  ;;  %v2021_v17 = vpack.c.bf16 %v301_v15, %v299_v14  ;;  %v300_v18 = vld [vmem:[%s2215_s10 + $0x28] sm:$0xff]  ;;  %v302_v19 = vld [vmem:[%s2215_s10 + $0x38] sm:$0xff]  ;;  %v303_v20 = vld [vmem:[%s2215_s10 + $0x40] sm:$0xff]  ;;  %1057 = vrot.lane.b32.xlu1 %v2262_v40, %s2116_s19  ;;  %vm1406_vm5 = vcmask 367616   ;;  %vm780_vm6 = vcmask 1031168   ;;  %s2141_s30 = smov 80  }
  0x13   : > { %2019 = vmatprep.subr.bf16.mxu0 %v2018_v12  ;;  %v2034_v22 = vpack.c.bf16 %v302_v19, %v300_v18  ;;  %v305_v23 = vld [vmem:[%s2215_s10 + $0x50] sm:$0xff]  ;;  %v304_v24 = vld [vmem:[%s2215_s10 + $0x48] sm:$0xff]  ;;  %v306_v25 = vld [vmem:[%s2215_s10 + $0x58] sm:$0xff]  ;;  %vm1029_vm7 = vcmask 801792   ;;  %vm1298_vm8 = vcmask 678912   ;;  %vm1274_vm9 = vcmask 1022976  }
  0x14   : > { %2031 = vmatprep.subr.bf16.mxu1 %v2030_v16  ;;  %2020 = vmatpush1.bf16.msra.mxu0 %v2114_v26  ;;  %v2024_v27 = vpack.c.bf16 %v305_v23, %v303_v20  ;;  %v2038_v28 = vpack.c.bf16 %v306_v25, %v304_v24  ;;  %v307_v29 = vld [vmem:[%s2215_s10 + $0x60] sm:$0xff]  ;;  %v309_v30 = vld [vmem:[%s2215_s10 + $0x70] sm:$0xff]  ;;  %v308_v32 = vld [vmem:[%s2215_s10 + $0x68] sm:$0xff]  ;;  %vm1457_vm10 = vcmask 416768   ;;  %vm739_vm11 = vcmask 1039360   ;;  %s2146_s13 = smov 95  }
  0x15   : > { %2033 = vmatpush3.bf16.msra.mxu1 %v2030_v16  ;;  %2022 = vmatprep.subr.bf16.mxu0 %v2021_v17  ;;  %v310_v33 = vld [vmem:[%s2215_s10 + $0x78] sm:$0xff]  ;;  %v2027_v36 = vpack.c.bf16 %v309_v30, %v307_v29  ;;  %s2123_s10 = smov 51   ;;  %vm763_vm12 = vcmask 924672   ;;  %vm838_vm13 = vcmask 7168   ;;  %vm871_vm14 = vcmask 121856  }
  0x16   : > { %2035 = vmatprep.subr.bf16.mxu1 %v2034_v22  ;;  %v2042_v37 = vpack.c.bf16 %v310_v33, %v308_v32  ;;  %1099 = vrot.lane.b32.xlu0 %v2223_v11, %s2115_s16  ;;  %vm922_vm15 = vcmask 138240  }
  0x17   : > { %1101 = vrot.lane.b32.xlu1 %v2233_v21, %s2115_s16  ;;  %s2134_s16 = smov 60  }
  0x18   : > { %2023 = vmatpush1.bf16.msra.mxu0 %v2114_v26 }
  0x19   : > { %2037 = vmatpush3.bf16.msra.mxu1 %v2034_v22  ;;  %2025 = vmatprep.subr.bf16.mxu0 %v2024_v27 }
  0x1a   : > { %2039 = vmatprep.subr.bf16.mxu1 %v2038_v28  ;;  %1294 = vrot.lane.b32.xlu0 %v2254_v38, %s2117_s20 }
  0x1b   : > { %1296 = vrot.lane.b32.xlu1 %v2283_v44, %s2117_s20  ;;  %s2121_s20 = smov 34  }
  0x1c   : > { %2026 = vmatpush1.bf16.msra.mxu0 %v2114_v26 }
  0x1d   : > { %2041 = vmatpush3.bf16.msra.mxu1 %v2038_v28  ;;  %2028 = vmatprep.subr.bf16.mxu0 %v2027_v36 }
  0x1e   : > { %2043 = vmatprep.subr.bf16.mxu1 %v2042_v37  ;;  %1324 = vrot.lane.b32.xlu0 %v2266_v41, %s2118_s27 }
  0x1f   : > { %1326 = vrot.lane.b32.xlu1 %v2298_v47, %s2118_s27 }
  0x20   : > { %2029 = vmatpush1.bf16.msra.mxu0 %v2114_v26 }
  0x21   : > { %2045 = vmatpush3.bf16.msra.mxu1 %v2042_v37 }
  0x22   : > { %2008 = vmatprep.subr.mxu1 %v2111_v2  ;;  %1132 = vrot.lane.b32.xlu0 %v2250_v35, %s2119_s9 }
  0x23   : > { %1898 = vmatmul.mubr.msk.f32.vlgmr.msra.gmra.mrb[0].mxu0 %vm373_vm0, %v2199_v0  ;;  %1134 = vrot.lane.b32.xlu1 %v2262_v40, %s2119_s9  ;;  %v1931_v0 = vld [vmem:[%s2891_s3 + $0x4] sm:$0xf]  ;;  %s2130_s9 = smov 17  }
  0x24   : > { %1988 = vmatmul.mubr.msk.f32.vlgmr.msra.gmra.mrb[0].mxu1 %vm373_vm0, %v328_v42  ;;  %486 = vmatprep.mubr.f32.mxu0 %v2111_v2 }
  0x25   : > { %1990 = vmatprep.mubr.msk.f32.mxu1 %vm373_vm0, %v329_v43 }
  0x26   : > { %1369 = vrot.lane.b32.xlu0 %v2254_v38, %s2120_s14 }
  0x27   : > { %1899 = vmatmul.mubr.msk.f32.gmra.mrb[2].mxu0 %vm373_vm0, %v328_v42  ;;  %1371 = vrot.lane.b32.xlu1 %v2283_v44, %s2120_s14  ;;  %s2133_s14 = smov 64  }
  0x28   : > { %1991 = vmatmul.mubr.msk.f32.gmra.mrb[2].mxu1 %vm373_vm0, %v330_v45  ;;  %492 = vmatprep.mubr.f32.mxu0 %v2111_v2 }
  0x29   : > { %1993 = vmatprep.mubr.msk.f32.mxu1 %vm373_vm0, %v331_v46 }
  0x2a   : > { %1182 = vrot.lane.b32.xlu0 %v2223_v11, %s2121_s20 }
  0x2b   : > { %1900 = vmatmul.mubr.msk.f32.gmra.mrb[4].mxu0 %vm373_vm0, %v329_v43  ;;  %1184 = vrot.lane.b32.xlu1 %v2233_v21, %s2121_s20 }
  0x2c   : > { %1994 = vmatmul.mubr.msk.f32.gmra.mrb[4].mxu1 %vm373_vm0, %v332_v48  ;;  %497 = vmatprep.mubr.f32.mxu0 %v2111_v2 }
  0x2d   : > { %1996 = vmatprep.mubr.msk.f32.mxu1 %vm373_vm0, %v333_v49 }
  0x2e   : > { %1402 = vrot.lane.b32.xlu0 %v2266_v41, %s2122_s28 }
  0x2f   : > { %1901 = vmatmul.mubr.msk.f32.gmra.mrb[6].mxu0 %vm373_vm0, %v330_v45  ;;  %1404 = vrot.lane.b32.xlu1 %v2298_v47, %s2122_s28  ;;  %s2139_s28 = smov 96  }
  0x30   : > { %1997 = vmatmul.mubr.msk.f32.gmra.mrb[6].mxu1 %vm373_vm0, %v334_v50  ;;  %502 = vmatprep.mubr.f32.mxu0 %v2111_v2 }
  0x31   : > { %1999 = vmatprep.mubr.msk.f32.mxu1 %vm373_vm0, %v335_v51 }
  0x32   : > { %1453 = vrot.lane.b32.xlu0 %v2254_v38, %s2123_s10 }
  0x33   : > { %1902 = vmatmul.mubr.msk.f32.gmra.mrb[8].mxu0 %vm373_vm0, %v331_v46  ;;  %1455 = vrot.lane.b32.xlu1 %v2283_v44, %s2123_s10  ;;  %s2131_s10 = smov 62  }
  0x34   : > { %2000 = vmatmul.mubr.msk.f32.gmra.mrb[8].mxu1 %vm373_vm0, %v336_v52  ;;  %508 = vmatprep.mubr.f32.mxu0 %v2111_v2 }
  0x35   : > { %2002 = vmatprep.mubr.msk.f32.mxu1 %vm373_vm0, %v337_v53 }
  0x36   : > { %980 = vrot.lane.b32.xlu0 %v2250_v35, %s2124_s15 }
  0x37   : > { %1903 = vmatmul.mubr.msk.f32.gmra.mrb[10].mxu0 %vm373_vm0, %v332_v48  ;;  %982 = vrot.lane.b32.xlu1 %v2262_v40, %s2124_s15 }
  0x38   : > { %2003 = vmatmul.mubr.msk.f32.gmra.mrb[10].mxu1 %vm373_vm0, %v338_v54  ;;  %514 = vmatprep.mubr.f32.mxu0 %v2111_v2 }
  0x39   : > { %2005 = vmatprep.mubr.msk.f32.mxu1 %vm373_vm0, %v339_v55 }
  0x3a   : > { %761 = vrot.lane.b32.xlu0 %v758_v58, %s2125_s18 }
  0x3b   : > { %1904 = vmatmul.mubr.msk.f32.gmra.mrb[12].mxu0 %vm373_vm0, %v333_v49  ;;  %759 = vrot.lane.b32.xlu1 %v754_v61, %s2125_s18  ;;  %s2136_s18 = smov 32  }
  0x3c   : > { %2006 = vmatmul.mubr.msk.f32.gmra.mrb[12].mxu1 %vm373_vm0, %v340_v57  ;;  %520 = vmatprep.mubr.f32.mxu0 %v2111_v2 }
  0x3e   : > { %791 = vrot.lane.b32.xlu0 %v2371_v60, %s2126_s21 }
  0x3f   : > { %1905 = vmatmul.mubr.msk.f32.gmra.mrb[14].mxu0 %vm373_vm0, %v334_v50  ;;  %789 = vrot.lane.b32.xlu1 %v2387_v62, %s2126_s21 }
  0x40   : > { %525 = vmatprep.mubr.f32.mxu0 %v2111_v2 }
  0x42   : > { %1247 = vrot.lane.b32.xlu0 %v2266_v41, %s2127_s22 }
  0x43   : > { %1906 = vmatmul.mubr.msk.f32.gmra.mrb[16].mxu0 %vm373_vm0, %v335_v51  ;;  %1249 = vrot.lane.b32.xlu1 %v2298_v47, %s2127_s22 }
  0x44   : > { %530 = vmatprep.mubr.f32.mxu0 %v2111_v2 }
  0x46   : > { %834 = vrot.lane.b32.xlu0 %v754_v61, %s2128_s23 }
  0x47   : > { %1907 = vmatmul.mubr.msk.f32.gmra.mrb[18].mxu0 %vm373_vm0, %v336_v52  ;;  %836 = vrot.lane.b32.xlu1 %v758_v58, %s2128_s23  ;;  %s2137_s23 = smov 74  }
  0x48   : > { %536 = vmatprep.mubr.f32.mxu0 %v2111_v2 }
  0x4a   : > { %1216 = vperm.xlu0 %2091, %v1930_v63  }
  0x4b   : > { %1908 = vmatmul.mubr.msk.f32.gmra.mrb[20].mxu0 %vm373_vm0, %v337_v53  ;;  %867 = vrot.lane.b32.xlu1 %v2387_v62, %s2129_s29 }
  0x4c   : > { %542 = vmatprep.mubr.f32.mxu0 %v2111_v2 }
  0x4e   : > { %869 = vrot.lane.b32.xlu0 %v2371_v60, %s2129_s29  ;;  %s2140_s29 = smov 122  }
  0x4f   : > { %1909 = vmatmul.mubr.msk.f32.gmra.mrb[22].mxu0 %vm373_vm0, %v338_v54  ;;  %1171 = vrot.lane.b32.xlu1 %v2410_v1, %s2131_s10 }
  0x50   : > { %547 = vmatprep.mubr.f32.mxu0 %v2111_v2 }
  0x52   : > { %1227 = vperm.xlu0 %2091, %v1931_v0  }
  0x53   : > { %1910 = vmatmul.mubr.msk.f32.gmra.mrb[24].mxu0 %vm373_vm0, %v339_v55  ;;  %918 = vrot.lane.b32.xlu1 %v754_v61, %s2130_s9 }
  0x54   : > { %552 = vmatprep.mubr.f32.mxu0 %v2111_v2 }
  0x56   : > { %920 = vrot.lane.b32.xlu0 %v758_v58, %s2130_s9 }
  0x57   : > { %1911 = vmatmul.mubr.msk.f32.gmra.mrb[26].mxu0 %vm373_vm0, %v340_v57  ;;  %1487 = vperm.xlu1 %2092, %v1933_v3  }
  0x5a   : > { %1442 = vrot.lane.b32.xlu0 %v2410_v1, %s2132_s11 }
  0x7f   : > { %v2421_v4 = vpop.permute.xlu1 %1055  ;;  %v2443_v20 = vpop.permute.xlu0 %1025 }
  0x83   : > { %v2445_v21 = vpop.permute.xlu0 %1027 }
  0x84   : > { %v2423_v5 = vpop.permute.xlu1 %1057 }
  0x88   : > { %v2447_v22 = vpop.permute.xlu0 %1099 }
  0x89   : > { %v1102_v6 = vpop.permute.xlu1 %1101 }
  0x8a   : > { %v1110_v12 = vmul.f32 0.0, %v1102_v6  ;;  %v1104_v42 = vsel %vm1103_vm1, %v2447_v22, %v1102_v6  ;;  %vm1123_vm1 = vcmask 752640  }
  0x8c   : > { %v1116_v16 = vrot.slane %v1110_v12, 4  ;;  %v2449_v23 = vpop.permute.xlu0 %1294 }
  0x8d   : > { %v2425_v7 = vpop.permute.xlu1 %1296 }
  0x90   : > { %v2465_v31 = vpop.permute.xlu0 %1324 }
  0x91   : > { %v2427_v8 = vpop.permute.xlu1 %1326 }
  0x94   : > { %v2474_v39 = vpop.permute.xlu0 %1132 }
  0x95   : > { %v1135_v9 = vpop.permute.xlu1 %1134 }
  0x96   : > { %v1143_v10 = vmul.f32 0.0, %v1135_v9  ;;  %v1137_v43 = vsel %vm1136_vm2, %v2474_v39, %v1135_v9  ;;  %vm1173_vm2 = vcmask 506880  }
  0x98   : > { %1151 = vrot.lane.b32.xlu1 %v1143_v10, %s2133_s14  ;;  %v2492_v55 = vpop.permute.xlu0 %1369 }
  0x99   : > { %v2430_v11 = vpop.permute.xlu1 %1371 }
  0x9a   : > { %v1380_v15 = vmul.f32 0.0, %v2430_v11  ;;  %v1374_v3 = vsel %vm1373_vm3, %v2492_v55, %v2430_v11  ;;  %vm1203_vm3 = vcmask 490496  }
  0x9c   : > { %v1386_v19 = vrot.slane %v1380_v15, 4  ;;  %v2505_v10 = vpop.permute.xlu0 %1182 }
  0x9d   : > { %v2432_v13 = vpop.permute.xlu1 %1184 }
  0x9e   : > { %v1193_v14 = vmul.f32 0.0, %v2432_v13 }
  0xa0   : > { %1201 = vrot.lane.b32.xlu1 %v1193_v14, %s2134_s16 }
  0xa1   : > { %v2437_v17 = vpop.permute.xlu1 %1404 }
  0xa2   : > { %v1413_v18 = vmul.f32 0.0, %v2437_v17 }
  0xa4   : > { %1121 = vrot.lane.b32.xlu1 %v1116_v16, %s2135_s17  ;;  %1421 = vrot.lane.b32.xlu0 %v1413_v18, %s2136_s18 }
  0xa8   : > { %1391 = vrot.lane.b32.xlu0 %v1386_v19, %s2137_s23  ;;  %v1187_v19 = vsel %vm1186_vm4, %v2505_v10, %v2432_v13 }
  0xf6   : > { %v2451_v24 = vpop.f32.mrb[0].mxu0 }
  0xf7   : > { %v2453_v25 = vpop.f32.mrb[0].mxu1  ;;  %v2455_v26 = vpop.f32.mrb[1].mxu0 }
  0xf8   : > { %v2457_v27 = vpop.f32.mrb[1].mxu1 }
  0xfa   : > { %v2459_v28 = vpop.f32.mrb[2].mxu0 }
  0xfb   : > { %v2461_v29 = vpop.f32.mrb[2].mxu1  ;;  %v2463_v30 = vpop.f32.mrb[3].mxu0 }
  0xfc   : > { %v2467_v32 = vpop.f32.mrb[3].mxu1 }
  0xfe   : > { %v494_v33 = vpop.f32.mrb[4].mxu0 }
  0xff   : > { %v1995_v34 = vpop.f32.mrb[4].mxu1  ;;  %v2469_v35 = vpop.f32.mrb[5].mxu0 }
 0x100   : > { %v999_v36 = vrot.slane %v1995_v34, 4  ;;  %v1036_v37 = vmul.f32 %v1995_v34, %v2445_v21  ;;  %v2472_v38 = vpop.f32.mrb[5].mxu1 }
 0x102   : > { %1044 = vrot.lane.b32.xlu1 %v1036_v37, %s2138_s26  ;;  %1004 = vrot.lane.b32.xlu0 %v999_v36, %s2116_s19  ;;  %v499_v40 = vpop.f32.mrb[6].mxu0  ;;  %v2512_v36 = vpop.permute.xlu0 %1402 }
 0x103   : > { %v1998_v41 = vpop.f32.mrb[6].mxu1  ;;  %v2480_v44 = vpop.f32.mrb[7].mxu0  ;;  %v1407_v40 = vsel %vm1406_vm5, %v2512_v36, %v2437_v17  ;;  %vm939_vm5 = vcmask 769024  }
 0x104   : > { %v1109_v45 = vmul.f32 %v1998_v41, %v1104_v42  ;;  %v1142_v46 = vmul.f32 %v1998_v41, %v1137_v43  ;;  %v657_v47 = vpop.f32.mrb[7].mxu1  ;;  %v1059_v43 = vsel %vm780_vm6, %v2421_v4, %v2423_v5 }
 0x105   : > { %v1065_v52 = vmul.f32 %v2423_v5, %v657_v47 }
 0x106   : > { %1149 = vrot.lane.b32.xlu0 %v1142_v46, %s2133_s14  ;;  %1090 = vrot.lane.b32.xlu1 %v657_v47, %s2124_s15  ;;  %v2484_v48 = vpop.f32.mrb[8].mxu0  ;;  %v1115_v51 = vrot.slane %v1109_v45, 4 }
 0x107   : > { %v2486_v49 = vpop.f32.mrb[8].mxu1  ;;  %v2488_v50 = vpop.f32.mrb[9].mxu0  ;;  %v1071_v61 = vrot.slane %v1065_v52, 4  ;;  %v1030_v52 = vsel %vm1029_vm7, %v2443_v20, %v2445_v21  ;;  %vm1046_vm7 = vcmask 1014784  }
 0x108   : > { %v1267_v53 = vrot.slane %v2486_v49, 4  ;;  %v668_v54 = vpop.f32.mrb[9].mxu1 }
 0x109   : > { %v1165_v12 = vrot.slane %v668_v54, 4  ;;  %v1192_v33 = vmul.f32 %v1187_v19, %v668_v54 }
 0x10a   : > { %1119 = vrot.lane.b32.xlu0 %v1115_v51, %s2135_s17  ;;  %1272 = vrot.lane.b32.xlu1 %v1267_v53, %s2118_s27  ;;  %v510_v56 = vpop.f32.mrb[10].mxu0 }
 0x10b   : > { %v1034_v57 = vmul.f32 %v2443_v20, %v510_v56  ;;  %v2004_v58 = vpop.f32.mrb[10].mxu1  ;;  %v512_v59 = vpop.f32.mrb[11].mxu0  ;;  %v997_v46 = vrot.slane %v510_v56, 4 }
 0x10c   : > { %v679_v63 = vpop.f32.mrb[11].mxu1  ;;  %v1379_v14 = vmul.f32 %v2004_v58, %v1374_v3  ;;  %v998_v15 = vrot.slane %v512_v59, 4  ;;  %v1035_v54 = vmul.f32 %v1030_v52, %v512_v59 }
 0x10d   : > { %v1334_v59 = vmul.f32 %v2427_v8, %v679_v63 }
 0x10e   : > { %1076 = vrot.lane.b32.xlu0 %v1071_v61, %s2139_s28  ;;  %1040 = vrot.lane.b32.xlu1 %v1034_v57, %s2138_s26  ;;  %v2499_v0 = vpop.f32.mrb[12].mxu0  ;;  %v1385_v34 = vrot.slane %v1379_v14, 4  ;;  %v1454_v14 = vpop.permute.xlu0 %1453 }
 0x10f   : > { %v2503_v6 = vpop.f32.mrb[12].mxu1  ;;  %v518_v9 = vpop.f32.mrb[13].mxu0  ;;  %v1063_v19 = vmul.f32 %v2421_v4, %v2499_v0 }
 0x110   : > { %v690_v16 = vpop.f32.mrb[13].mxu1  ;;  %v1064_v47 = vmul.f32 %v1059_v43, %v518_v9 }
 0x111   : > { %v1412_v42 = vmul.f32 %v1407_v40, %v690_v16  ;;  %v1436_v51 = vrot.slane %v690_v16, 4 }
 0x112   : > { %1169 = vrot.lane.b32.xlu0 %v1165_v12, %s2131_s10  ;;  %1002 = vrot.lane.b32.xlu1 %v998_v15, %s2116_s19  ;;  %v522_v18 = vpop.f32.mrb[14].mxu0  ;;  %v1070_v57 = vrot.slane %v1064_v47, 4  ;;  %v1456_v15 = vpop.permute.xlu1 %1455 }
 0x113   : > { %v523_v11 = vpop.f32.mrb[15].mxu0 }
 0x114   : > { %v1108_v61 = vmul.f32 %v2447_v22, %v523_v11  ;;  %v1141_v3 = vmul.f32 %v2474_v39, %v523_v11  ;;  %v1340_v39 = vrot.slane %v1334_v59, 4  ;;  %v730_v59 = vrot.slane %v2451_v24, 4 }
 0x116   : > { %1199 = vrot.lane.b32.xlu0 %v1192_v33, %s2134_s16  ;;  %1389 = vrot.lane.b32.xlu1 %v1385_v34, %s2137_s23  ;;  %v527_v37 = vpop.f32.mrb[16].mxu0  ;;  %v1114_v12 = vrot.slane %v1108_v61, 4  ;;  %v2547_v11 = vpop.permute.xlu1 %982  ;;  %v1069_v33 = vrot.slane %v1063_v19, 4  ;;  %v1464_v61 = vmul.f32 0.0, %v1456_v15 }
 0x117   : > { %v528_v41 = vpop.f32.mrb[17].mxu0 }
 0x118   : > { %v1164_v16 = vrot.slane %v528_v41, 4 }
 0x11a   : > { %1360 = vrot.lane.b32.xlu0 %v2004_v58, %s2127_s22  ;;  %1419 = vrot.lane.b32.xlu1 %v1412_v42, %s2136_s18  ;;  %v2520_v13 = vpop.f32.mrb[18].mxu0  ;;  %v1305_v58 = vmul.f32 %v2425_v7, %v679_v63  ;;  %v2545_v63 = vpop.permute.xlu0 %980 }
 0x11b   : > { %v2525_v45 = vpop.f32.mrb[19].mxu0  ;;  %v1265_v34 = vrot.slane %v2520_v13, 4  ;;  %v760_v0 = vpop.permute.xlu1 %759 }
 0x11c   : > { %v1266_v37 = vrot.slane %v2525_v45, 4 }
 0x11e   : > { %1000 = vrot.lane.b32.xlu0 %v997_v46, %s2116_s19  ;;  %1440 = vrot.lane.b32.xlu1 %v1436_v51, %s2132_s11  ;;  %v538_v17 = vpop.f32.mrb[20].mxu0  ;;  %v2554_v4 = vpop.permute.xlu0 %761  ;;  %v1328_v46 = vsel %vm1274_vm9, %v2465_v31, %v2427_v8  ;;  %v1934_v8 = vld [vmem:[%s2891_s3 + $0x8] sm:$0xf] }
 0x11f   : > { %v540_v53 = vpop.f32.mrb[21].mxu0  ;;  %v1303_v40 = vmul.f32 %v2449_v23, %v538_v17  ;;  %v790_v51 = vpop.permute.xlu1 %789 }
 0x122   : > { %1042 = vrot.lane.b32.xlu0 %v1035_v54, %s2138_s26  ;;  %1074 = vrot.lane.b32.xlu1 %v1070_v57, %s2139_s28  ;;  %v544_v5 = vpop.f32.mrb[22].mxu0  ;;  %v792_v47 = vpop.permute.xlu0 %791  ;;  %v1333_v54 = vmul.f32 %v1328_v46, %v540_v53 }
 0x123   : > { %v545_v56 = vpop.f32.mrb[23].mxu0  ;;  %v2573_v57 = vpop.permute.xlu1 %1249 }
 0x124   : > { %v1378_v43 = vmul.f32 %v2492_v55, %v545_v56 }
 0x126   : > { %1313 = vrot.lane.b32.xlu0 %v1305_v58, %s2140_s29  ;;  %1147 = vrot.lane.b32.xlu1 %v1141_v3, %s2133_s14  ;;  %v549_v20 = vpop.f32.mrb[24].mxu0  ;;  %v1458_v58 = vsel %vm1457_vm10, %v1454_v14, %v1456_v15  ;;  %v764_v15 = vsel %vm763_vm12, %v760_v0, %v2554_v4  ;;  %vm1393_vm10 = vcmask 605184   ;;  %vm1251_vm12 = vcmask 629760  }
 0x127   : > { %v550_v21 = vpop.f32.mrb[25].mxu0  ;;  %v1463_v3 = vmul.f32 %v2503_v6, %v1458_v58  ;;  %v732_v6 = vrot.slane %v2457_v27, 4  ;;  %v769_v19 = vmul.f32 %v764_v15, %v2463_v30 }
 0x128   : > { %v1411_v55 = vmul.f32 %v2512_v36, %v550_v21  ;;  %v1435_v5 = vrot.slane %v550_v21, 4  ;;  %v837_v36 = vpop.permute.xlu1 %836 }
 0x12a   : > { %1088 = vrot.lane.b32.xlu0 %v518_v9, %s2124_s15  ;;  %1117 = vrot.lane.b32.xlu1 %v1114_v12, %s2135_s17  ;;  %v554_v22 = vpop.f32.mrb[26].mxu0  ;;  %v1191_v9 = vmul.f32 %v2505_v10, %v528_v41  ;;  %v1299_v10 = vsel %vm1298_vm8, %v2449_v23, %v2425_v7  ;;  %v1332_v41 = vmul.f32 %v2465_v31, %v538_v17  ;;  %v1384_v7 = vrot.slane %v1378_v43, 4  ;;  %v2571_v17 = vpop.permute.xlu0 %1247 }
 0x12b   : > { %v555_v18 = vpop.f32.mrb[27].mxu0  ;;  %v1304_v42 = vmul.f32 %v1299_v10, %v540_v53  ;;  %v1339_v23 = vrot.slane %v1333_v54, 4  ;;  %v731_v12 = vrot.slane %v2455_v26, 4  ;;  %vm888_vm8 = vcmask 785408  }
 0x12c   : > { %v1338_v52 = vrot.slane %v1332_v41, 4  ;;  %v1462_v53 = vmul.f32 %v1454_v14, %v555_v18  ;;  %v868_v21 = vpop.permute.xlu1 %867  ;;  %v770_v18 = vmul.f32 %v2453_v25, %v2554_v4 }
 0x12e   : > { %1345 = vrot.lane.b32.xlu0 %v1340_v39, %s2141_s30  ;;  %1167 = vrot.lane.b32.xlu1 %v1164_v16, %s2131_s10  ;;  %v835_v31 = vpop.permute.xlu0 %834  ;;  %s2142_s10 = smov 26   ;;  %v797_v39 = vmul.f32 %v790_v51, %v2459_v28 }
 0x12f   : > { %v843_v4 = vmul.f32 %v835_v31, %v2469_v35  ;;  %v839_v41 = vsel %vm838_vm13, %v835_v31, %v837_v36  ;;  %vm1347_vm13 = vcmask 654336  }
 0x130   : > { %v2591_v14 = vpop.permute.xlu1 %1171 }
 0x131   : > { %v849_v43 = vrot.slane %v843_v4, 4 }
 0x132   : > { %1072 = vrot.lane.b32.xlu0 %v1069_v33, %s2139_s28  ;;  %1197 = vrot.lane.b32.xlu1 %v1191_v9, %s2134_s16  ;;  %v2583_v20 = vpop.permute.xlu0 %1216 }
 0x134   : > { %v2601_v22 = vpop.permute.xlu1 %918 }
 0x135   : > { %v927_v15 = vmul.f32 %v2601_v22, %v2488_v50 }
 0x136   : > { %1268 = vrot.lane.b32.xlu1 %v1265_v34, %s2118_s27  ;;  %1270 = vrot.lane.b32.xlu0 %v1266_v37, %s2118_s27  ;;  %v799_v34 = vmul.f32 %v2453_v25, %v792_v47  ;;  %v803_v37 = vrot.slane %v797_v39, 4  ;;  %v845_v25 = vmul.f32 0.0, %v837_v36  ;;  %v901_v36 = vrot.slane %v2461_v29, 4 }
 0x138   : > { %v2610_v9 = vpop.permute.xlu1 %1487 }
 0x13a   : > { %1309 = vrot.lane.b32.xlu0 %v1303_v40, %s2140_s29  ;;  %1311 = vrot.lane.b32.xlu1 %v1304_v42, %s2140_s29  ;;  %v844_v42 = vmul.f32 %v839_v41, %v2467_v32 }
 0x13e   : > { %1341 = vrot.lane.b32.xlu1 %v1338_v52, %s2141_s30  ;;  %1387 = vrot.lane.b32.xlu0 %v1384_v7, %s2137_s23  ;;  %v850_v52 = vrot.slane %v844_v42, 4  ;;  %v876_v7 = vmul.f32 %v868_v21, %v2480_v44  ;;  %v2686_v42 = vrot.slane %v2583_v20, 4  ;;  %v984_v20 = vsel %vm939_vm5, %v2545_v63, %v2547_v11 }
 0x142   : > { %1343 = vrot.lane.b32.xlu1 %v1339_v23, %s2141_s30  ;;  %1417 = vrot.lane.b32.xlu0 %v1411_v55, %s2136_s18 }
 0x146   : > { %1358 = vrot.lane.b32.xlu1 %v545_v56, %s2127_s22  ;;  %1438 = vrot.lane.b32.xlu0 %v1435_v5, %s2132_s11  ;;  %s2143_s22 = smov 111   ;;  %v870_v56 = vpop.permute.xlu0 %869 }
 0x147   : > { %v872_v54 = vsel %vm871_vm14, %v868_v21, %v870_v56  ;;  %v878_v5 = vmul.f32 0.0, %v870_v56  ;;  %v1258_v21 = vmul.f32 %v2486_v49, %v2573_v57  ;;  %vm1444_vm14 = vcmask 236544  }
 0x14a   : > { %1497 = vperm.xlu1 %2092, %v1934_v8   ;;  %1468 = vrot.lane.b32.xlu0 %v1462_v53, %s2142_s10  ;;  %v2599_v16 = vpop.permute.xlu0 %1227  ;;  %v900_v53 = vrot.slane %v2480_v44, 4 }
 0x14e   : > { %1470 = vrot.lane.b32.xlu1 %v1463_v3, %s2142_s10  ;;  %1472 = vrot.lane.b32.xlu0 %v1464_v61, %s2142_s10  ;;  %v2615_v10 = vpop.permute.xlu0 %920  ;;  %v990_v3 = vmul.f32 %v2547_v11, %v2472_v38 }
 0x152   : > { %712 = vrot.lane.b32.xlu1 %v2387_v62, %s2143_s22  ;;  %714 = vrot.lane.b32.xlu0 %v2371_v60, %s2143_s22  ;;  %v768_v62 = vmul.f32 %v760_v0, %v2459_v28  ;;  %v793_v60 = vsel %vm739_vm11, %v790_v51, %v792_v47  ;;  %v805_v28 = vrot.slane %v799_v34, 4  ;;  %v2620_v40 = vpop.permute.xlu0 %1442  ;;  %v851_v51 = vrot.slane %v845_v25, 4 }
 0x153   : > { %v798_v33 = vmul.f32 %v793_v60, %v2463_v30  ;;  %v2618_v30 = vpop.permute.xlu1 %1151 }
 0x155   : > { %v804_v0 = vrot.slane %v798_v33, 4 }
 0x156   : > { %733 = vrot.lane.b32.xlu1 %v730_v59, %s2126_s21  ;;  %735 = vrot.lane.b32.xlu0 %v731_v12, %s2126_s21  ;;  %v2627_v47 = vpop.permute.xlu0 %1421  ;;  %v923_v12 = vsel %vm922_vm15, %v2601_v22, %v2615_v10 }
 0x157   : > { %v2625_v46 = vpop.permute.xlu1 %1201 }
 0x15a   : > { %737 = vrot.lane.b32.xlu1 %v732_v6, %s2126_s21  ;;  %774 = vrot.lane.b32.xlu0 %v768_v62, %s2116_s19  ;;  %s2144_s21 = smov 112   ;;  %v2633_v55 = vpop.permute.xlu0 %1391  ;;  %v928_v62 = vmul.f32 %v923_v12, %v2472_v38 }
 0x15b   : > { %v1122_v23 = vpop.permute.xlu1 %1121 }
 0x15e   : > { %776 = vrot.lane.b32.xlu1 %v769_v19, %s2116_s19  ;;  %778 = vrot.lane.b32.xlu0 %v770_v18, %s2116_s19  ;;  %s2145_s19 = smov 110  }
 0x162   : > { %806 = vrot.lane.b32.xlu1 %v803_v37, %s2144_s21  ;;  %808 = vrot.lane.b32.xlu0 %v804_v0, %s2144_s21 }
 0x166   : > { %810 = vrot.lane.b32.xlu1 %v805_v28, %s2144_s21  ;;  %823 = vrot.lane.b32.xlu0 %v2469_v35, %s2143_s22  ;;  %v877_v35 = vmul.f32 %v2461_v29, %v872_v54  ;;  %v957_v29 = vld [vmem:[%s2891_s3] sm:$0xf] }
 0x16a   : > { %825 = vrot.lane.b32.xlu1 %v2467_v32, %s2143_s22  ;;  %852 = vrot.lane.b32.xlu0 %v849_v43, %s2145_s19  ;;  %v948_v32 = vld [vmem:[%s2890_s2] sm:$0xf] }
 0x16e   : > { %854 = vrot.lane.b32.xlu1 %v850_v52, %s2145_s19  ;;  %856 = vrot.lane.b32.xlu0 %v851_v51, %s2145_s19  ;;  %v2693_v52 = vrot.slane %v2599_v16, 4 }
 0x172   : > { %882 = vrot.lane.b32.xlu1 %v876_v7, %s2139_s28  ;;  %884 = vrot.lane.b32.xlu0 %v877_v35, %s2139_s28 }
 0x174   : > { %v2640_v8 = vpop.permute.xlu1 %1044  ;;  %v1005_v31 = vpop.permute.xlu0 %1004 }
 0x175   : > { %v1013_v56 = vadd.f32 %v1005_v31, %v990_v3 }
 0x176   : > { %886 = vrot.lane.b32.xlu1 %v878_v5, %s2139_s28  ;;  %951 = vperm.xlu0 %2091, %v948_v32   ;;  %v989_v32 = vmul.f32 %v984_v20, %v2488_v50 }
 0x177   : > { %v1054_v49 = vadd.f32 %v2640_v8, %v1013_v56 }
 0x178   : > { %v2645_v58 = vpop.permute.xlu0 %1149  ;;  %v2647_v61 = vpop.permute.xlu1 %1090 }
 0x179   : > { %v1154_v22 = vsel %vm373_vm0, %v2645_v58, %v2618_v30 }
 0x17a   : > { %903 = vrot.lane.b32.xlu1 %v900_v53, %s2146_s13  ;;  %905 = vrot.lane.b32.xlu0 %v901_v36, %s2146_s13 }
 0x17c   : > { %v2656_v44 = vpop.permute.xlu0 %1119  ;;  %v2658_v59 = vpop.permute.xlu1 %1272 }
 0x17d   : > { %v1282_v6 = vadd.f32 %v2658_v59, %v1258_v21  ;;  %v1125_v33 = vsel %vm1123_vm1, %v2656_v44, %v1122_v23 }
 0x17e   : > { %907 = vrot.lane.b32.xlu1 %v2410_v1, %s2146_s13  ;;  %960 = vperm.xlu0 %2091, %v957_v29   ;;  %v929_v1 = vmul.f32 0.0, %v2615_v10 }
 0x180   : > { %v1077_v60 = vpop.permute.xlu0 %1076  ;;  %v1041_v18 = vpop.permute.xlu1 %1040 }
 0x181   : > { %v1085_v39 = vadd.f32 %v1077_v60, %v1054_v49 }
 0x182   : > { %933 = vrot.lane.b32.xlu1 %v927_v15, %s2124_s15  ;;  %935 = vrot.lane.b32.xlu0 %v928_v62, %s2124_s15 }
 0x183   : > { %v1098_v19 = vadd.f32 %v2647_v61, %v1085_v39 }
 0x184   : > { %v1170_v34 = vpop.permute.xlu0 %1169  ;;  %v1003_v38 = vpop.permute.xlu1 %1002 }
 0x185   : > { %v1131_v37 = vadd.f32 %v1125_v33, %v1098_v19  ;;  %v1175_v28 = vsel %vm1173_vm2, %v1170_v34, %v2591_v14  ;;  %v1007_v23 = vsel %vm780_vm6, %v1003_v38, %v1005_v31  ;;  %v988_v19 = vmul.f32 %v2545_v63, %v2484_v48 }
 0x186   : > { %937 = vrot.lane.b32.xlu1 %v929_v1, %s2124_s15  ;;  %v1012_v3 = vadd.f32 %v1007_v23, %v989_v32 }
 0x187   : > { %v1160_v0 = vadd.f32 %v1154_v22, %v1131_v37 }
 0x188   : > { %v1200_v4 = vpop.permute.xlu0 %1199  ;;  %v2681_v10 = vpop.permute.xlu1 %1389 }
 0x189   : > { %v1181_v41 = vadd.f32 %v1175_v28, %v1160_v0  ;;  %v1205_v25 = vsel %vm1203_vm3, %v1200_v4, %v2625_v46  ;;  %v1395_v48 = vsel %vm1393_vm10, %v2681_v10, %v2633_v55 }
 0x18b   : > { %v1211_v43 = vadd.f32 %v1205_v25, %v1181_v41 }
 0x18c   : > { %v2688_v51 = vpop.permute.xlu0 %1360  ;;  %v2690_v30 = vpop.permute.xlu1 %1419 }
 0x18d   : > { %v1222_v14 = vmul.f32 %v2686_v42, %v1211_v43 }
 0x18f   : > { %v2697_v54 = vadd.f32 %v2693_v52, %v1222_v14 }
 0x190   : > { %v1001_v35 = vpop.permute.xlu0 %1000  ;;  %v2699_v7 = vpop.permute.xlu1 %1440 }
 0x191   : > { %v1236_v46 = vmax.f32 %v2697_v54, 0.0  ;;  %v1006_v15 = vsel %vm780_vm6, %v1001_v35, %v1003_v38 }
 0x192   : > { %v1011_v38 = vadd.f32 %v1006_v15, %v988_v19 }
 0x193   : > { %v1511_v16 = vrot.slane %v1236_v46, 4 }
 0x194   : > { %v1043_v5 = vpop.permute.xlu0 %1042  ;;  %v1075_v36 = vpop.permute.xlu1 %1074 }
 0x195   : > { %v1048_v53 = vsel %vm1046_vm7, %v1043_v5, %v2640_v8  ;;  %1516 = vrot.lane.b32.xlu0 %v1511_v16, %s2130_s9  ;;  %v1079_v31 = vsel %vm888_vm8, %v1075_v36, %v1077_v60  ;;  %v1047_v37 = vsel %vm1046_vm7, %v1041_v18, %v1043_v5  ;;  %vm858_vm7 = vcmask 900096  }
 0x196   : > { %v1053_v21 = vadd.f32 %v1048_v53, %v1012_v3  ;;  %v1052_v63 = vadd.f32 %v1047_v37, %v1011_v38 }
 0x198   : > { %v2712_v11 = vpop.permute.xlu0 %1313  ;;  %v1148_v56 = vpop.permute.xlu1 %1147  ;;  %v1084_v29 = vadd.f32 %v1079_v31, %v1053_v21 }
 0x199   : > { %v1323_v8 = vadd.f32 %v2712_v11, %v1282_v6 }
 0x19c   : > { %v1089_v12 = vpop.permute.xlu0 %1088  ;;  %v1118_v49 = vpop.permute.xlu1 %1117 }
 0x19d   : > { %v1092_v50 = vsel %vm939_vm5, %v1089_v12, %v2647_v61  ;;  %v1124_v39 = vsel %vm1123_vm1, %v1118_v49, %v2656_v44  ;;  %v1153_v61 = vsel %vm373_vm0, %v1148_v56, %v2645_v58  ;;  %v1252_v58 = vsel %vm1251_vm12, %v2571_v17, %v2573_v57 }
 0x19e   : > { %v1097_v62 = vadd.f32 %v1092_v50, %v1084_v29  ;;  %v1257_v20 = vmul.f32 %v1252_v58, %v2525_v45  ;;  %vm1315_vm0 = vcmask 998400   ;;  %vm1474_vm1 = vcmask 211968  }
 0x1a0   : > { %v1130_v1 = vadd.f32 %v1124_v39, %v1097_v62  ;;  %v1346_v33 = vpop.permute.xlu0 %1345  ;;  %v1168_v60 = vpop.permute.xlu1 %1167 }
 0x1a1   : > { %v1355_v22 = vadd.f32 %v1346_v33, %v1323_v8  ;;  %v1174_v44 = vsel %vm1173_vm2, %v1168_v60, %v1170_v34  ;;  %vm812_vm2 = vcmask 916480  }
 0x1a2   : > { %v1159_v0 = vadd.f32 %v1153_v61, %v1130_v1 }
 0x1a3   : > { %v1368_v6 = vadd.f32 %v2688_v51, %v1355_v22 }
 0x1a4   : > { %v1180_v28 = vadd.f32 %v1174_v44, %v1159_v0  ;;  %v1073_v41 = vpop.permute.xlu0 %1072  ;;  %v1198_v25 = vpop.permute.xlu1 %1197 }
 0x1a5   : > { %v2734_v18 = vadd.f32 %v1395_v48, %v1368_v6  ;;  %v1078_v43 = vsel %vm888_vm8, %v1073_v41, %v1075_v36  ;;  %v1204_v14 = vsel %vm1203_vm3, %v1198_v25, %v1200_v4  ;;  %vm716_vm3 = vcmask 908288  }
 0x1a6   : > { %v1083_v35 = vadd.f32 %v1078_v43, %v1052_v63  ;;  %v1210_v34 = vadd.f32 %v1204_v14, %v1180_v28 }
 0x1a8   : > { %v1096_v23 = vadd.f32 %v1089_v12, %v1083_v35  ;;  %v1221_v55 = vmul.f32 %v2686_v42, %v1210_v34  ;;  %v1269_v16 = vpop.permute.xlu1 %1268  ;;  %v1271_v32 = vpop.permute.xlu0 %1270 }
 0x1a9   : > { %v1276_v5 = vsel %vm1274_vm9, %v1271_v32, %v2658_v59  ;;  %v1275_v12 = vsel %vm1274_vm9, %v1269_v16, %v1271_v32  ;;  %v1256_v59 = vmul.f32 %v2571_v17, %v2520_v13  ;;  %vm1423_vm9 = vcmask 261120  }
 0x1aa   : > { %v1129_v53 = vadd.f32 %v1118_v49, %v1096_v23  ;;  %v2743_v57 = vadd.f32 %v2693_v52, %v1221_v55  ;;  %v1281_v3 = vadd.f32 %v1276_v5, %v1257_v20  ;;  %v1425_v35 = vsel %vm1423_vm9, %v2690_v30, %v2627_v47 }
 0x1ab   : > { %v1280_v8 = vadd.f32 %v1275_v12, %v1256_v59  ;;  %v1431_v23 = vadd.f32 %v1425_v35, %v2734_v18 }
 0x1ac   : > { %v1158_v36 = vadd.f32 %v1148_v56, %v1129_v53  ;;  %v1235_v4 = vmax.f32 %v2743_v57, 0.0  ;;  %v1310_v21 = vpop.permute.xlu0 %1309  ;;  %v1312_v31 = vpop.permute.xlu1 %1311 }
 0x1ad   : > { %v1316_v56 = vsel %vm1315_vm0, %v1310_v21, %v1312_v31 }
 0x1ae   : > { %v1179_v29 = vadd.f32 %v1168_v60, %v1158_v36  ;;  %v1510_v45 = vrot.slane %v1235_v4, 4  ;;  %v1321_v19 = vadd.f32 %v1316_v56, %v1280_v8 }
 0x1b0   : > { %v1209_v49 = vadd.f32 %v1198_v25, %v1179_v29  ;;  %v1342_v50 = vpop.permute.xlu1 %1341  ;;  %1514 = vrot.lane.b32.xlu1 %v1510_v45, %s2130_s9  ;;  %v1388_v62 = vpop.permute.xlu0 %1387 }
 0x1b1   : > { %v1394_v43 = vsel %vm1393_vm10, %v1388_v62, %v2681_v10  ;;  %v1446_v10 = vsel %vm1444_vm14, %v2699_v7, %v2620_v40 }
 0x1b2   : > { %v1220_v15 = vmul.f32 %v2686_v42, %v1209_v49  ;;  %v1317_v42 = vsel %vm1315_vm0, %v1312_v31, %v2712_v11 }
 0x1b3   : > { %v1322_v6 = vadd.f32 %v1317_v42, %v1281_v3 }
 0x1b4   : > { %v2755_v39 = vadd.f32 %v2693_v52, %v1220_v15  ;;  %v1344_v1 = vpop.permute.xlu1 %1343  ;;  %v1418_v17 = vpop.permute.xlu0 %1417 }
 0x1b5   : > { %v1348_v60 = vsel %vm1347_vm13, %v1342_v50, %v1344_v1  ;;  %v1349_v52 = vsel %vm1347_vm13, %v1344_v1, %v1346_v33  ;;  %v1424_v33 = vsel %vm1423_vm9, %v1418_v17, %v2690_v30  ;;  %v1452_v30 = vadd.f32 %v1446_v10, %v1431_v23 }
 0x1b6   : > { %v1234_v37 = vmax.f32 %v2755_v39, 0.0  ;;  %v1353_v13 = vadd.f32 %v1348_v60, %v1321_v19  ;;  %v1354_v28 = vadd.f32 %v1349_v52, %v1322_v6 }
 0x1b8   : > { %v1359_v61 = vpop.permute.xlu1 %1358  ;;  %v1509_v22 = vrot.slane %v1234_v37, 4  ;;  %v1439_v48 = vpop.permute.xlu0 %1438 }
 0x1b9   : > { %v1366_v38 = vadd.f32 %v1359_v61, %v1353_v13  ;;  %v1362_v63 = vsel %vm1251_vm12, %v1359_v61, %v2688_v51  ;;  %v1445_v16 = vsel %vm1444_vm14, %v1439_v48, %v2699_v7 }
 0x1ba   : > { %1512 = vrot.lane.b32.xlu0 %v1509_v22, %s2130_s9  ;;  %v1367_v25 = vadd.f32 %v1362_v63, %v1354_v28 }
 0x1bb   : > { %v1399_v0 = vadd.f32 %v1388_v62, %v1366_v38 }
 0x1bc   : > { %v1469_v58 = vpop.permute.xlu0 %1468  ;;  %v1400_v11 = vadd.f32 %v1394_v43, %v1367_v25 }
 0x1bd   : > { %v1429_v44 = vadd.f32 %v1418_v17, %v1399_v0 }
 0x1be   : > { %v1430_v20 = vadd.f32 %v1424_v33, %v1400_v11 }
 0x1bf   : > { %v1450_v41 = vadd.f32 %v1439_v48, %v1429_v44 }
 0x1c0   : > { %v1451_v47 = vadd.f32 %v1445_v16, %v1430_v20  ;;  %v1473_v5 = vpop.permute.xlu0 %1472 }
 0x1c1   : > { %v1480_v14 = vadd.f32 %v1469_v58, %v1450_v41 }
 0x1c3   : > { %v1490_v34 = vmul.f32 %v2610_v9, %v1480_v14 }
 0x1c4   : > { %v715_v50 = vpop.permute.xlu0 %714 }
 0x1c8   : > { %v736_v56 = vpop.permute.xlu0 %735 }
 0x1c9   : > { %v1498_v51 = vpop.permute.xlu1 %1497 }
 0x1ca   : > { %v2772_v55 = vadd.f32 %v1498_v51, %v1490_v34  ;;  %v723_v34 = vmul.f32 %v715_v50, %v2457_v27 }
 0x1cc   : > { %v1503_v32 = vmax.f32 %v2772_v55, 0.0  ;;  %v775_v15 = vpop.permute.xlu0 %774 }
 0x1cd   : > { %v1471_v53 = vpop.permute.xlu1 %1470 }
 0x1ce   : > { %v1475_v3 = vsel %vm1474_vm1, %v1469_v58, %v1471_v53  ;;  %v1476_v36 = vsel %vm1474_vm1, %v1471_v53, %v1473_v5  ;;  %1529 = vrot.lane.b32.xlu1 %v1503_v32, %s2121_s20 }
 0x1cf   : > { %v1481_v18 = vadd.f32 %v1475_v3, %v1451_v47  ;;  %v1482_v21 = vadd.f32 %v1476_v36, %v1452_v30 }
 0x1d0   : > { %v779_v19 = vpop.permute.xlu0 %778 }
 0x1d1   : > { %v1491_v31 = vmul.f32 %v2610_v9, %v1481_v18  ;;  %v1492_v40 = vmul.f32 %v2610_v9, %v1482_v21  ;;  %v713_v59 = vpop.permute.xlu1 %712 }
 0x1d2   : > { %v721_v6 = vmul.f32 %v713_v59, %v2451_v24  ;;  %v717_v11 = vsel %vm716_vm3, %v713_v59, %v715_v50 }
 0x1d3   : > { %v2783_v29 = vadd.f32 %v1498_v51, %v1491_v31  ;;  %v2785_v7 = vadd.f32 %v1498_v51, %v1492_v40  ;;  %v722_v20 = vmul.f32 %v717_v11, %v2455_v26 }
 0x1d4   : > { %v809_v60 = vpop.permute.xlu0 %808 }
 0x1d5   : > { %v1504_v45 = vmax.f32 %v2783_v29, 0.0  ;;  %v1505_v12 = vmax.f32 %v2785_v7, 0.0  ;;  %v734_v49 = vpop.permute.xlu1 %733 }
 0x1d6   : > { %v740_v0 = vsel %vm739_vm11, %v734_v49, %v736_v56 }
 0x1d7   : > { %1531 = vrot.lane.b32.xlu0 %v1504_v45, %s2121_s20  ;;  %1533 = vrot.lane.b32.xlu1 %v1505_v12, %s2121_s20  ;;  %v745_v63 = vadd.f32 %v740_v0, %v721_v6 }
 0x1d8   : > { %v824_v17 = vpop.permute.xlu0 %823 }
 0x1d9   : > { %v738_v9 = vpop.permute.xlu1 %737 }
 0x1da   : > { %v741_v24 = vsel %vm739_vm11, %v736_v56, %v738_v9  ;;  %v747_v51 = vadd.f32 %v738_v9, %v723_v34  ;;  %vm1556_vm11 = vcmask 1043456  }
 0x1db   : > { %v746_v16 = vadd.f32 %v741_v24, %v722_v20 }
 0x1dc   : > { %v853_v22 = vpop.permute.xlu0 %852  ;;  %v788_v36 = vadd.f32 %v779_v19, %v747_v51 }
 0x1dd   : > { %v777_v62 = vpop.permute.xlu1 %776 }
 0x1de   : > { %v781_v44 = vsel %vm780_vm6, %v775_v15, %v777_v62  ;;  %v782_v10 = vsel %vm780_vm6, %v777_v62, %v779_v19  ;;  %vm909_vm6 = vcmask 777216  }
 0x1df   : > { %v786_v41 = vadd.f32 %v781_v44, %v745_v63  ;;  %v787_v3 = vadd.f32 %v782_v10, %v746_v16 }
 0x1e0   : > { %v857_v42 = vpop.permute.xlu0 %856 }
 0x1e1   : > { %v807_v8 = vpop.permute.xlu1 %806 }
 0x1e2   : > { %v813_v28 = vsel %vm812_vm2, %v807_v8, %v809_v60 }
 0x1e3   : > { %v818_v43 = vadd.f32 %v813_v28, %v786_v41 }
 0x1e4   : > { %v885_v48 = vpop.permute.xlu0 %884 }
 0x1e5   : > { %v811_v1 = vpop.permute.xlu1 %810  ;;  %v831_v14 = vadd.f32 %v824_v17, %v818_v43 }
 0x1e6   : > { %v814_v5 = vsel %vm812_vm2, %v809_v60, %v811_v1  ;;  %v820_v31 = vadd.f32 %v811_v1, %v788_v36 }
 0x1e7   : > { %v864_v23 = vadd.f32 %v853_v22, %v831_v14  ;;  %v819_v21 = vadd.f32 %v814_v5, %v787_v3 }
 0x1e9   : > { %v826_v13 = vpop.permute.xlu1 %825 }
 0x1ea   : > { %v827_v27 = vsel %vm716_vm3, %v824_v17, %v826_v13  ;;  %v833_v50 = vadd.f32 %v826_v13, %v820_v31 }
 0x1eb   : > { %v832_v49 = vadd.f32 %v827_v27, %v819_v21 }
 0x1ed   : > { %v855_v61 = vpop.permute.xlu1 %854 }
 0x1ee   : > { %v859_v26 = vsel %vm858_vm7, %v853_v22, %v855_v61  ;;  %v860_v59 = vsel %vm858_vm7, %v855_v61, %v857_v42 }
 0x1ef   : > { %v865_v15 = vadd.f32 %v859_v26, %v832_v49  ;;  %v866_v8 = vadd.f32 %v860_v59, %v833_v50 }
 0x1f1   : > { %v883_v38 = vpop.permute.xlu1 %882 }
 0x1f2   : > { %v894_v47 = vadd.f32 %v883_v38, %v864_v23  ;;  %v889_v9 = vsel %vm888_vm8, %v883_v38, %v885_v48 }
 0x1f3   : > { %v895_v17 = vadd.f32 %v889_v9, %v865_v15  ;;  %v1564_v9 = vld [vmem:[%s2892_s4] sm:$0xf] }
 0x1f5   : > { %v887_v52 = vpop.permute.xlu1 %886  ;;  %v952_v25 = vpop.permute.xlu0 %951 }
 0x1f6   : > { %v890_v56 = vsel %vm888_vm8, %v885_v48, %v887_v52  ;;  %vm1565_vm8 = vcmask 31744  }
 0x1f7   : > { %v896_v44 = vadd.f32 %v890_v56, %v866_v8  ;;  %v1643_v56 = vld [vmem:[%s2893_s5] sm:$0xff] }
 0x1f9   : > { %v904_v58 = vpop.permute.xlu1 %903  ;;  %v906_v35 = vpop.permute.xlu0 %905 }
 0x1fa   : > { %v915_v18 = vadd.f32 %v904_v58, %v894_v47  ;;  %v910_v0 = vsel %vm909_vm6, %v904_v58, %v906_v35 }
 0x1fb   : > { %v916_v13 = vadd.f32 %v910_v0, %v895_v17 }
 0x1fd   : > { %v908_v33 = vpop.permute.xlu1 %907  ;;  %v961_v30 = vpop.permute.xlu0 %960 }
 0x1fe   : > { %v911_v6 = vsel %vm909_vm6, %v906_v35, %v908_v33 }
 0x1ff   : > { %v917_v42 = vadd.f32 %v911_v6, %v896_v44 }
 0x201   : > { %v934_v53 = vpop.permute.xlu1 %933  ;;  %v936_v62 = vpop.permute.xlu0 %935 }
 0x202   : > { %v945_v40 = vadd.f32 %v934_v53, %v915_v18  ;;  %v940_v1 = vsel %vm939_vm5, %v934_v53, %v936_v62 }
 0x203   : > { %v946_v38 = vadd.f32 %v940_v1, %v916_v13 }
 0x204   : > { %v954_v19 = vmul.f32 %v952_v25, %v945_v40 }
 0x205   : > { %v938_v60 = vpop.permute.xlu1 %937  ;;  %v955_v43 = vmul.f32 %v952_v25, %v946_v38 }
 0x206   : > { %v941_v61 = vsel %vm939_vm5, %v936_v62, %v938_v60  ;;  %v2810_v63 = vadd.f32 %v961_v30, %v954_v19  ;;  %vm2147_vm5 = vmmov 0  }
 0x207   : > { %v1517_v22 = vpop.permute.xlu0 %1516  ;;  %v947_v52 = vadd.f32 %v941_v61, %v917_v42  ;;  %v2817_v34 = vadd.f32 %v961_v30, %v955_v43  ;;  %2010 = vmatprep.mubr.msk.f32.mxu1 %vm2147_vm5, %v2111_v2  ;;  %v1644_v2 = vld [vmem:[%s2893_s5 + $0x8] sm:$0xf] }
 0x208   : > { %v966_v41 = vmax.f32 %v2810_v63, 0.0 }
 0x209   : > { %v956_v58 = vmul.f32 %v952_v25, %v947_v52  ;;  %v967_v23 = vmax.f32 %v2817_v34, 0.0 }
 0x20b   : > { %v2815_v33 = vadd.f32 %v961_v30, %v956_v58 }
 0x20d   : > { %v968_v51 = vmax.f32 %v2815_v33, 0.0 }
 0x222   : > { %v1515_v48 = vpop.permute.xlu1 %1514 }
 0x223   : > { %v1519_v24 = vsel %vm922_vm15, %v1515_v48, %v1517_v22 }
 0x224   : > { %v1525_v25 = vadd.f32 %v1519_v24, %v968_v51 }
 0x22c   : > { %v1513_v28 = vpop.permute.xlu0 %1512 }
 0x22d   : > { %v1523_v14 = vadd.f32 %v1513_v28, %v966_v41  ;;  %v1518_v20 = vsel %vm922_vm15, %v1513_v28, %v1515_v48 }
 0x22e   : > { %v1524_v10 = vadd.f32 %v1518_v20, %v967_v23 }
 0x240   : > { %v1530_v11 = vpop.permute.xlu1 %1529 }
 0x241   : > { %v1540_v35 = vadd.f32 %v1530_v11, %v1523_v14 }
 0x243   : > { %1546 = vrot.lane.b32.xlu0 %v1540_v35, %s2130_s9 }
 0x249   : > { %v1534_v16 = vpop.permute.xlu1 %1533  ;;  %v1532_v47 = vpop.permute.xlu0 %1531 }
 0x24a   : > { %v1535_v5 = vsel %vm1186_vm4, %v1530_v11, %v1532_v47  ;;  %v1536_v30 = vsel %vm1186_vm4, %v1532_v47, %v1534_v16 }
 0x24b   : > { %v1541_v53 = vadd.f32 %v1535_v5, %v1524_v10  ;;  %v1542_v3 = vadd.f32 %v1536_v30, %v1525_v25 }
 0x24d   : > { %1550 = vrot.lane.b32.xlu0 %v1542_v3, %s2130_s9  ;;  %1548 = vrot.lane.b32.xlu1 %v1541_v53, %s2130_s9 }
 0x2b5   : > { %v1547_v36 = vpop.permute.xlu0 %1546 }
 0x2bf   : > { %v1549_v18 = vpop.permute.xlu1 %1548  ;;  %v1551_v27 = vpop.permute.xlu0 %1550 }
 0x2c0   : > { %v1552_v21 = vsel %vm922_vm15, %v1547_v36, %v1549_v18  ;;  %v1553_v31 = vsel %vm922_vm15, %v1549_v18, %v1551_v27 }
 0x2c1   : > { %v1557_v40 = vsel %vm1556_vm11, %v1552_v21, 0.0  ;;  %v1558_v26 = vsel %vm1556_vm11, %v1553_v31, 0.0 }
 0x2c2   : > { %v1559_v59 = vadd.f32 %v1558_v26, %v1557_v40 }
 0x2c4   : > { %1560 = vadd.xlane.f32.xlu1 %v1559_v59 }
 0x351   : > { %v1561_v49 = vpop.xlane.xlu1 %1560 }
 0x352   : > { %v1563_v50 = vmul.f32 0.00390625, %v1561_v49 }
 0x354   : > { %2009 = vmatpush3.msk.msra.mxu1 %vm1556_vm11, %v1563_v50 }
 0x355   : > { %2011 = vmatmul.mubr.msk.f32.vlgmr.msra.gmra.mrb[14].mxu1 %vm1565_vm8, %v1564_v9 }
 0x356   : > { %2015 = vmatprep.mubr.msk.f32.mxu1 %vm1565_vm8, %v1643_v56 }
 0x428   : > { %v1638_v62 = vpop.f32.mrb[14].mxu1 }
 0x429   : > { %v1642_v15 = vmax.f32 %v1638_v62, 0.0  ;;  %v2012_v8 = vpop.f32.mrb[15].mxu1 }
 0x42b   : > { %2013 = vmatprep.subr.msk.mxu1 %vm1556_vm11, %v1642_v15 }
 0x42c   : > { %2014 = vmatpush3.msk.msra.mxu1 %vm1556_vm11, %v1642_v15 }
 0x42d   : > { %2016 = vmatmul.mubr.msk.f32.vlgmr.msra.gmra.mrb[16].mxu1 %vm1565_vm8, %v1644_v2 }
 0x500   : > { %v2017_v19 = vpop.f32.mrb[16].mxu1 }
 0x501   : > { %v1720_v60 = vpop.f32.mrb[17].mxu1 }
 0x502   : > { %v1730_v0 = vrot.slane %v1720_v60, 4 }
 0x504   : > { %v1732_v6 = vmax.f32 %v1720_v60, %v1730_v0 }
 0x506   : > { %v1733_v17 = vmax.f32 %v1732_v6, %v2017_v19 }
 0x508   : > { %v1734_v44 = vsub.f32 %v1720_v60, %v1733_v17  ;;  %v1738_v1 = vrot.slane %v1733_v17, 4  ;;  %v1743_v61 = vsub.f32 %v2017_v19, %v1733_v17 }
 0x50a   : > { %v1740_v22 = vsub.f32 %v1720_v60, %v1738_v1  ;;  %v1735_v13 = vmul.f32 1.442695, %v1734_v44  ;;  %v1744_v38 = vmul.f32 1.442695, %v1743_v61 }
 0x50c   : > { %v1741_v42 = vmul.f32 1.442695, %v1740_v22 }
 0x50e   : > { %2093 = vpow2.f32 %v1741_v42 }
 0x50f   : > { %2095 = vpow2.f32 %v1735_v13 }
 0x510   : > { %2097 = vpow2.f32 %v1744_v38 }
 0x518   : > { %v2094_v52 = vpop.eup %2093 }
 0x519   : > { %v1747_v48 = vrot.slane %v2094_v52, 4  ;;  %v2096_v28 = vpop.eup %2095 }
 0x51a   : > { %v2098_v58 = vpop.eup %2097 }
 0x51b   : > { %v1749_v43 = vadd.f32 %v2096_v28, %v1747_v48 }
 0x51d   : > { %v1750_v14 = vadd.f32 %v2098_v58, %v1749_v43 }
 0x51f   : > { %v1762_v11 = vrot.slane %v1750_v14, 4  ;;  %2099 = vrcp.f32 %v1750_v14 }
 0x521   : > { %2101 = vrcp.f32 %v1762_v11 }
 0x529   : > { %v2100_v35 = vpop.eup %2099 }
 0x52a   : > { %v1794_v24 = vmul.f32 %v2100_v35, %v2098_v58  ;;  %v1752_v20 = vmul.f32 %v2100_v35, %v2096_v28 }
 0x52b   : > { %v2102_v25 = vpop.eup %2101 }
 0x52c   : > { %v1765_v10 = vmul.f32 %v2102_v25, %v2094_v52 }
 0x52e   : > { %1768 = vperm.xlu0 %2091, %v1765_v10  }
 0x532   : > { %1797 = vperm.xlu0 %2091, %v1794_v24  }
 0x536   : > { %1755 = vperm.xlu0 %2091, %v1752_v20  }
 0x5ad   : > { %v1769_v16 = vpop.permute.xlu0 %1768 }
 0x5ae   : > { %v1771_v30 = vmul.f32 %v1769_v16, %v1234_v37  ;;  %v1772_v3 = vmul.f32 %v1769_v16, %v1235_v4  ;;  %v1773_v55 = vmul.f32 %v1769_v16, %v1236_v46 }
 0x5b0   : > { %v1777_v36 = vrot.slane %v1771_v30, 4  ;;  %v1779_v18 = vrot.slane %v1773_v55, 4 }
 0x5b1   : > { %v1798_v47 = vpop.permute.xlu0 %1797 }
 0x5b2   : > { %v1800_v5 = vmul.f32 %v1798_v47, %v1503_v32  ;;  %v1801_v53 = vmul.f32 %v1798_v47, %v1504_v45  ;;  %v1778_v32 = vrot.slane %v1772_v3, 4  ;;  %v1802_v39 = vmul.f32 %v1798_v47, %v1505_v12 }
 0x5b4   : > { %1806 = vrot.lane.b32.xlu0 %v1800_v5, %s2121_s20 }
 0x5b5   : > { %v1756_v37 = vpop.permute.xlu0 %1755 }
 0x5b6   : > { %v1758_v45 = vmul.f32 %v1756_v37, %v966_v41  ;;  %v1759_v54 = vmul.f32 %v1756_v37, %v967_v23  ;;  %v1760_v63 = vmul.f32 %v1756_v37, %v968_v51 }
 0x5b8   : > { %1808 = vrot.lane.b32.xlu0 %v1801_v53, %s2121_s20 }
 0x5bc   : > { %1780 = vrot.lane.b32.xlu0 %v1777_v36, %s2130_s9 }
 0x5c0   : > { %1782 = vrot.lane.b32.xlu0 %v1778_v32, %s2130_s9 }
 0x5c4   : > { %1784 = vrot.lane.b32.xlu0 %v1779_v18, %s2130_s9 }
 0x5c8   : > { %1810 = vrot.lane.b32.xlu0 %v1802_v39, %s2121_s20  ;;  %s1943_s20 = sshll.u32 %s2897_s25, 3 }
 0x5c9   : > { %s278_s27 = scalar_lea.vmem %s2895_s7, %s1943_s20 }
 0x626   : > { %v1807_v57 = vpop.permute.xlu0 %1806 }
 0x62a   : > { %v1809_v4 = vpop.permute.xlu0 %1808 }
 0x62b   : > { %v1812_v7 = vsel %vm1186_vm4, %v1807_v57, %v1809_v4 }
 0x62e   : > { %v1781_v29 = vpop.permute.xlu0 %1780 }
 0x62f   : > { %v1791_v46 = vadd.f32 %v1781_v29, %v1758_v45 }
 0x631   : > { %v1817_v12 = vadd.f32 %v1807_v57, %v1791_v46 }
 0x632   : > { %v1783_v27 = vpop.permute.xlu0 %1782 }
 0x633   : > { %v1786_v21 = vsel %vm922_vm15, %v1781_v29, %v1783_v27 }
 0x634   : > { %v1792_v31 = vadd.f32 %v1786_v21, %v1759_v54 }
 0x636   : > { %v1818_v40 = vadd.f32 %v1812_v7, %v1792_v31  ;;  %v1785_v26 = vpop.permute.xlu0 %1784 }
 0x637   : > { %v1787_v59 = vsel %vm922_vm15, %v1783_v27, %v1785_v26 }
 0x638   : > { %v1823_v41 = vcombine.low %v1817_v12, %v1818_v40  ;;  %v1793_v49 = vadd.f32 %v1787_v59, %v1760_v63 }
 0x63a   : > { %1824 = vrot.lane.b32.xlu1 %v1823_v41, %s2130_s9  ;;  %v1811_v34 = vpop.permute.xlu0 %1810 }
 0x63b   : > { %v1813_v23 = vsel %vm1186_vm4, %v1809_v4, %v1811_v34 }
 0x63c   : > { %v1819_v50 = vadd.f32 %v1813_v23, %v1793_v49 }
 0x63e   : > { %1826 = vrot.lane.b32.xlu0 %v1819_v50, %s2130_s9 }
 0x6ac   : > { %v1825_v9 = vpop.permute.xlu1 %1824 }
 0x6ad   : > { %v1828_v62 = vrot.slane %v1825_v9, 4 }
 0x6b0   : > { %v1827_v56 = vpop.permute.xlu0 %1826 }
 0x6b1   : > { %v1829_v15 = vrot.slane %v1827_v56, 4 }
 0x6b3   : > { %v1830_v33 = vsel %vm1556_vm11, %v1828_v62, %v1829_v15 }
 0x6b4   : > { %v1831_v51 = vsel %vm922_vm15, %v1825_v9, %v1830_v33 }
 0x6b5   : > { %1833 = vst [vmem:[%s278_s27] sm:$0xff] %v1831_v51 }
 0x6b6 PF: > { %s17_s24 = sadd.s32 1, %s2109_s24  }
 0x6b7   : > { %p14_p4 = scmp.ge.s32.totalorder %s17_s24, 4  }
 0x6b9   :  { %16 = sbr.rel (!%p14_p4) target bundleno = 1 (0x1), region = 87 }

</bundles_post_ra>
